<compile_context>
chip_gen: v6e
topology: v6e:2x2x1
jax: 0.10.0
libtpu: 0.0.40
codegen_flags: <defaults>
</compile_context>

<pallas_src>
import math
from functools import partial

import jax
import jax.numpy as jnp
from jax.experimental import pallas as pl
from jax.experimental.pallas import tpu as pltpu


_INV_SQRT2 = 1.0 / math.sqrt(2.0)
_MASK_VALUE = -1e30  # finite "minus infinity" for padded-key masking


def _gelu_exact_f32(x):
    # torch.nn.functional.gelu default (erf-based), computed in f32.
    return 0.5 * x * (1.0 + jax.lax.erf(x * _INV_SQRT2))


# --------------------------------------------------------------------------
# Stage 1: fused linear + gelu projection of K and V (once per token).
# --------------------------------------------------------------------------
def _proj_kv_kernel(k_ref, v_ref, wkt_ref, wvt_ref, ko_ref, vo_ref):
    mm = wkt_ref.dtype  # MXU operand dtype (bf16 when mxu_bf16, else input dtype)
    kk = jnp.dot(k_ref[0].astype(mm), wkt_ref[...],
                 preferred_element_type=jnp.float32)
    ko_ref[0] = _gelu_exact_f32(kk).astype(ko_ref.dtype)
    vv = jnp.dot(v_ref[0].astype(mm), wvt_ref[...],
                 preferred_element_type=jnp.float32)
    vo_ref[0] = _gelu_exact_f32(vv).astype(vo_ref.dtype)


# --------------------------------------------------------------------------
# Stage 2: flash-style attention with fused Q / output projections + gelu.
# --------------------------------------------------------------------------
def _xattention_kernel(q_ref, k_ref, v_ref, wqt_ref, wot_ref, o_ref,
                       q_proj, m_scr, l_scr, acc_scr,
                       *, eta, is_residual, sm_scale, seq_len, block_kv,
                       needs_mask):
    """Fused XAttention forward for one (batch, q-tile), streamed over kv tiles.

    Block shapes seen by the kernel:
      q_ref, o_ref            : (1, block_q,  D)   original dtype
      k_ref, v_ref            : (1, block_kv, D)   already projected+gelu'd, mm dtype
      wqt_ref, wot_ref        : (D, D)             pre-transposed, mm dtype
    Scratch (persists across the kv grid axis):
      q_proj  : (block_q, D)  gelu(q @ Wq^T) * sm_scale, mm dtype
      m_scr   : (block_q, 1)  running row max                     (f32)
      l_scr   : (block_q, 1)  running softmax denominator         (f32)
      acc_scr : (block_q, D)  unnormalized p @ v accumulator      (f32)
    """
    kv = pl.program_id(2)
    mm_dtype = q_proj.dtype

    @pl.when(kv == 0)
    def _init():
        # Project + activate + pre-scale the Q tile once per (batch, q-tile).
        xq = q_ref[0].astype(mm_dtype)
        _q = _gelu_exact_f32(
            jnp.dot(xq, wqt_ref[...], preferred_element_type=jnp.float32))
        q_proj[...] = (_q * sm_scale).astype(mm_dtype)
        m_scr[...] = jnp.full(m_scr.shape, -jnp.inf, m_scr.dtype)
        l_scr[...] = jnp.zeros(l_scr.shape, l_scr.dtype)
        acc_scr[...] = jnp.zeros(acc_scr.shape, acc_scr.dtype)

    k_t = k_ref[0]
    v_t = v_ref[0]

    # Scores for this kv tile (sm_scale already folded into q_proj); contract
    # the feature dim directly — no explicit transpose of k_t.
    s = jax.lax.dot_general(q_proj[...], k_t, (((1,), (1,)), ((), ())),
                            preferred_element_type=jnp.float32)
    if needs_mask:  # static: only traced when the sequence was padded
        col = kv * block_kv + jax.lax.broadcasted_iota(jnp.int32, s.shape, 1)
        s = jnp.where(col < seq_len, s, _MASK_VALUE)

    # Online (flash) softmax update.
    m_prev = m_scr[...]
    m_new = jnp.maximum(m_prev, jnp.max(s, axis=-1, keepdims=True))
    alpha = jnp.exp(m_prev - m_new)
    p = jnp.exp(s - m_new)
    l_scr[...] = alpha * l_scr[...] + jnp.sum(p, axis=-1, keepdims=True)
    acc_scr[...] = alpha * acc_scr[...] + jnp.dot(
        p.astype(mm_dtype), v_t, preferred_element_type=jnp.float32)
    m_scr[...] = m_new

    @pl.when(kv == pl.num_programs(2) - 1)
    def _finalize():
        # Deferred normalization: (block_q, 1) reciprocal instead of an
        # (S, S) divide.  approx=False keeps the tight-f32-tolerance path exact.
        y = acc_scr[...] * pl.reciprocal(l_scr[...], approx=False)
        y = _gelu_exact_f32(
            jnp.dot(y.astype(mm_dtype), wot_ref[...],
                    preferred_element_type=jnp.float32))
        out = eta * y
        if is_residual:
            out = q_ref[0].astype(jnp.float32) + out
        o_ref[0] = out.astype(o_ref.dtype)


# --------------------------------------------------------------------------
# Tiling / VMEM helpers.
# --------------------------------------------------------------------------
def _round_up(x, m):
    return (x + m - 1) // m * m


def _exact_block(seq_len, desired):
    """Largest multiple-of-8 divisor of seq_len that is <= desired (or None)."""
    if seq_len % 8 != 0:
        return None
    blk = min(desired, seq_len)
    blk -= blk % 8
    while blk >= 8 and seq_len % blk != 0:
        blk -= 8
    return blk if blk >= 8 else None


def _pow2_block(seq_len, desired):
    """Largest power-of-two block (>= 8) not exceeding desired / ~seq_len."""
    cap = min(desired, _round_up(seq_len, 8))
    blk = 8
    while blk * 2 <= cap:
        blk *= 2
    return blk


def _choose_blocks(seq_len, desired_q, desired_kv):
    """Return (block_q, block_kv, padded_seq_len).

    Prefers exact divisors (no padding); otherwise falls back to power-of-two
    blocks plus padding + key masking.  Never falls back to a full-S block for
    long sequences (which would blow VMEM)."""
    bq = _exact_block(seq_len, desired_q)
    bkv = _exact_block(seq_len, desired_kv)
    floor = min(128, _round_up(seq_len, 8))
    if bq is not None and bkv is not None and bq >= floor and bkv >= floor:
        return bq, bkv, seq_len
    bq = _pow2_block(seq_len, desired_q)
    bkv = _pow2_block(seq_len, desired_kv)
    s_pad = _round_up(seq_len, max(bq, bkv))  # both (pow2) blocks divide this
    return bq, bkv, s_pad


def _vmem_capacity_bytes():
    try:
        return int(pltpu.get_tpu_info().vmem_capacity_bytes)
    except Exception:
        return 64 * 1024 * 1024  # conservative fallback (v7x per-core VMEM)


def _vmem_limit(estimate_bytes):
    cap = _vmem_capacity_bytes()
    want = max(16 * 1024 * 1024, 2 * estimate_bytes)
    return int(min(want, cap - 16 * 1024 * 1024))


def _attn_vmem_estimate(bq, bkv, D, in_bytes, mm_bytes):
    io = 2 * 2 * bq * D * in_bytes               # q in + out blocks, 2x-buffered
    kvb = 2 * 2 * bkv * D * mm_bytes             # projected k/v tiles, 2x-buffered
    wts = 2 * 2 * D * D * mm_bytes               # WqT + WoT, 2x-buffered
    scr = bq * D * (mm_bytes + 4) + 2 * bq * 4   # q_proj + acc + m/l scratch
    tmp = (bq * bkv + bq * D + bkv * D) * 4      # f32 s/p + misc temps
    return io + kvb + wts + scr + tmp


def _proj_vmem_estimate(blk, D, in_bytes, mm_bytes):
    return (2 * 2 * blk * D * in_bytes           # k, v input tiles
            + 2 * 2 * blk * D * mm_bytes         # projected outputs
            + 2 * 2 * D * D * mm_bytes           # WkT, WvT
            + 2 * blk * D * 4)                   # f32 temps


# --------------------------------------------------------------------------
# Wrapper.
# --------------------------------------------------------------------------
def xattention_pallas(q, k, v, wq, wk, wv, wo, *, eta=1e-4, is_residual=False,
                      block_q=256, block_kv=512, mxu_bf16=True):
    """XAttention forward.  q/k/v: (B, S, D); weights in PyTorch nn.Linear
    layout (out_features, in_features), applied as x @ W^T.

    mxu_bf16: run all matmul operands in bf16 (f32 accumulation) even for f32
    inputs — the MXUs on v5e/v6e/v7x are bf16-native; set False for bit-tight
    f32 results."""
    B, S, D = q.shape
    in_dtype = q.dtype
    mm_dtype = jnp.bfloat16 if (mxu_bf16 and in_dtype == jnp.float32) else in_dtype
    mm_bytes = jnp.dtype(mm_dtype).itemsize
    in_bytes = jnp.dtype(in_dtype).itemsize

    bq, bkv, s_pad = _choose_blocks(S, block_q, block_kv)
    pad = s_pad - S
    if pad:
        zpad = ((0, 0), (0, pad), (0, 0))
        q_p, k_p, v_p = (jnp.pad(x, zpad) for x in (q, k, v))
    else:
        q_p, k_p, v_p = q, k, v

    # Pre-transpose (out, in) weights once so kernels run x @ W in the
    # MXU-native layout, and cast them to the matmul operand dtype.
    wqt = wq.T.astype(mm_dtype)
    wkt = wk.T.astype(mm_dtype)
    wvt = wv.T.astype(mm_dtype)
    wot = wo.T.astype(mm_dtype)

    # ---- Stage 1: projected + activated K / V (hoisted out of the kv loop).
    x_map = lambda b, i: (b, i, 0)
    w_map1 = lambda b, i: (0, 0)
    k_proj, v_proj = pl.pallas_call(
        _proj_kv_kernel,
        out_shape=(jax.ShapeDtypeStruct((B, s_pad, D), mm_dtype),
                   jax.ShapeDtypeStruct((B, s_pad, D), mm_dtype)),
        grid_spec=pltpu.PrefetchScalarGridSpec(
            num_scalar_prefetch=0,
            grid=(B, s_pad // bkv),
            in_specs=[
                pl.BlockSpec((1, bkv, D), x_map),
                pl.BlockSpec((1, bkv, D), x_map),
                pl.BlockSpec((D, D), w_map1),
                pl.BlockSpec((D, D), w_map1),
            ],
            out_specs=[
                pl.BlockSpec((1, bkv, D), x_map),
                pl.BlockSpec((1, bkv, D), x_map),
            ]),
        compiler_params=pltpu.CompilerParams(
            dimension_semantics=("parallel", "parallel"),
            vmem_limit_bytes=_vmem_limit(
                _proj_vmem_estimate(bkv, D, in_bytes, mm_bytes))),
    )(k_p, v_p, wkt, wvt)

    # ---- Stage 2: flash attention + output projection, gelu, eta / residual.
    # NOTE(v7x): B * (s_pad // bq) is the "parallel" extent that shards across
    # the 2 TensorCores; with B >= 2 (or >= 2 q-tiles) both cores are busy.
    # The constant-index weight blocks are DMA'd once; their second pipeline
    # buffer could be reclaimed with pipeline_mode=pl.Buffered(1) if VMEM ever
    # gets tight at very large D.
    grid = (B, s_pad // bq, s_pad // bkv)
    q_map = lambda b, qi, kvi: (b, qi, 0)
    kv_map = lambda b, qi, kvi: (b, kvi, 0)
    w_map2 = lambda b, qi, kvi: (0, 0)

    kernel = partial(_xattention_kernel,
                     eta=float(eta),
                     is_residual=bool(is_residual),
                     sm_scale=1.0 / math.sqrt(D),
                     seq_len=S,
                     block_kv=bkv,
                     needs_mask=(pad != 0))

    out = pl.pallas_call(
        kernel,
        out_shape=jax.ShapeDtypeStruct((B, s_pad, D), in_dtype),
        grid_spec=pltpu.PrefetchScalarGridSpec(
            num_scalar_prefetch=0,
            grid=grid,
            in_specs=[
                pl.BlockSpec((1, bq, D), q_map),
                pl.BlockSpec((1, bkv, D), kv_map),
                pl.BlockSpec((1, bkv, D), kv_map),
                pl.BlockSpec((D, D), w_map2),
                pl.BlockSpec((D, D), w_map2),
            ],
            out_specs=pl.BlockSpec((1, bq, D), q_map),
            scratch_shapes=[
                pltpu.VMEM((bq, D), mm_dtype),      # projected+scaled Q tile
                pltpu.VMEM((bq, 1), jnp.float32),   # running max
                pltpu.VMEM((bq, 1), jnp.float32),   # running denominator
                pltpu.VMEM((bq, D), jnp.float32),   # output accumulator
            ]),
        compiler_params=pltpu.CompilerParams(
            dimension_semantics=("parallel", "parallel", "arbitrary"),
            vmem_limit_bytes=_vmem_limit(
                _attn_vmem_estimate(bq, bkv, D, in_bytes, mm_bytes))),
    )(q_p, k_proj, v_proj, wqt, wot)

    if pad:
        out = out[:, :S, :]
    return out


# --------------------------------------------------------------------------
# Pure-JAX reference mirroring the PyTorch forward (erf gelu).
# --------------------------------------------------------------------------
def xattention_ref(q, k, v, wq, wk, wv, wo, *, eta=1e-4, is_residual=False):
    g = lambda x: 0.5 * x * (1.0 + jax.lax.erf(x / math.sqrt(2.0)))
    _q = g(q @ wq.T)
    _k = g(k @ wk.T)
    _v = g(v @ wv.T)
    dk = _q.shape[-1]
    scores = jnp.einsum("bqd,bkd->bqk", _q, _k) / math.sqrt(dk)
    attn = jax.nn.softmax(scores, axis=-1)
    y = jnp.einsum("bqk,bkd->bqd", attn, _v)
    y = g(y @ wo.T)
    return q + eta * y if is_residual else eta * y


if __name__ == "__main__":
    B, S, D = 2, 256, 128
    key = jax.random.PRNGKey(0)
    kq, kk, kv_, kwq, kwk, kwv, kwo = jax.random.split(key, 7)

    q = jax.random.normal(kq, (B, S, D), dtype=jnp.float32)
    k = jax.random.normal(kk, (B, S, D), dtype=jnp.float32)
    v = jax.random.normal(kv_, (B, S, D), dtype=jnp.float32)

    scale = 1.0 / math.sqrt(D)
    wq = scale * jax.random.normal(kwq, (D, D), dtype=jnp.float32)
    wk = scale * jax.random.normal(kwk, (D, D), dtype=jnp.float32)
    wv = scale * jax.random.normal(kwv, (D, D), dtype=jnp.float32)
    wo = scale * jax.random.normal(kwo, (D, D), dtype=jnp.float32)

    ref = xattention_ref(q, k, v, wq, wk, wv, wo, eta=1e-4, is_residual=False)
    ref_res = xattention_ref(q, k, v, wq, wk, wv, wo, eta=1e-4, is_residual=True)

    # 1) f32-exact MXU path (tight tolerance), non-residual + residual.
    out = xattention_pallas(q, k, v, wq, wk, wv, wo, eta=1e-4,
                            is_residual=False, mxu_bf16=False)
    out = jax.block_until_ready(out)
    out_res = xattention_pallas(q, k, v, wq, wk, wv, wo, eta=1e-4,
                                is_residual=True, mxu_bf16=False)
    out_res = jax.block_until_ready(out_res)
    assert out.shape == (B, S, D)
    assert jnp.allclose(out, ref, atol=1e-5, rtol=1e-5)
    assert jnp.allclose(out_res, ref_res, atol=1e-5, rtol=1e-5)

    # 2) Default perf path: f32 inputs, bf16 MXU operands, f32 accumulation.
    out_fast = xattention_pallas(q, k, v, wq, wk, wv, wo, eta=1e-4,
                                 is_residual=False)
    out_fast = jax.block_until_ready(out_fast)
    assert jnp.allclose(out_fast, ref, atol=1e-3, rtol=1e-2)

    # 3) bf16 inputs + bf16 weights (f32 accumulation inside the kernels).
    qb, kb, vb = (x.astype(jnp.bfloat16) for x in (q, k, v))
    wqb, wkb, wvb, wob = (w.astype(jnp.bfloat16) for w in (wq, wk, wv, wo))
    out_bf16 = xattention_pallas(qb, kb, vb, wqb, wkb, wvb, wob, eta=1e-4,
                                 is_residual=False)
    out_bf16 = jax.block_until_ready(out_bf16)
    ref_bf16 = xattention_ref(*(x.astype(jnp.float32) for x in (qb, kb, vb)),
                              *(w.astype(jnp.float32) for w in (wqb, wkb, wvb, wob)),
                              eta=1e-4, is_residual=False)
    assert out_bf16.shape == (B, S, D)
    assert jnp.allclose(out_bf16.astype(jnp.float32), ref_bf16,
                        atol=1e-3, rtol=1e-2)

    # 4) Awkward sequence length (not a multiple of 8): exercises the
    #    pad-to-tile + key-masking path instead of a full-S block fallback.
    S2 = 100
    q2, k2, v2 = q[:, :S2, :], k[:, :S2, :], v[:, :S2, :]
    out2 = xattention_pallas(q2, k2, v2, wq, wk, wv, wo, eta=1e-4,
                             is_residual=True, mxu_bf16=False)
    out2 = jax.block_until_ready(out2)
    ref2 = xattention_ref(q2, k2, v2, wq, wk, wv, wo, eta=1e-4,
                          is_residual=True)
    assert out2.shape == (B, S2, D)
    assert jnp.allclose(out2, ref2, atol=1e-5, rtol=1e-5)

    print("KERNEL_OK")
</pallas_src>

<mosaic_0001>
module attributes {stable_mosaic.version = 11 : i64} {
  func.func @_proj_kv_kernel(%arg0: i32, %arg1: i32, %arg2: memref<1x256x128xf32, #tpu.memory_space<vmem>>, %arg3: memref<1x256x128xf32, #tpu.memory_space<vmem>>, %arg4: memref<128x128xf32, #tpu.memory_space<vmem>>, %arg5: memref<128x128xf32, #tpu.memory_space<vmem>>, %arg6: memref<1x256x128xf32, #tpu.memory_space<vmem>>, %arg7: memref<1x256x128xf32, #tpu.memory_space<vmem>>) attributes {dimension_semantics = [#tpu.dimension_semantics<parallel>, #tpu.dimension_semantics<parallel>], iteration_bounds = array<i64: 2, 1>, scalar_prefetch = 0 : i64, scratch_operands = 0 : i64, tpu.core_type = #tpu.core_type<tc>, window_params = [{transform_indices = @transform_0, window_bounds = array<i64: 1, 256, 128>}, {transform_indices = @transform_1, window_bounds = array<i64: 1, 256, 128>}, {pipeline_mode = #tpu.pipeline_mode<synchronous>, transform_indices = @transform_2, window_bounds = array<i64: 128, 128>}, {pipeline_mode = #tpu.pipeline_mode<synchronous>, transform_indices = @transform_3, window_bounds = array<i64: 128, 128>}, {transform_indices = @transform_4, window_bounds = array<i64: 1, 256, 128>}, {transform_indices = @transform_5, window_bounds = array<i64: 1, 256, 128>}]} {
    %c0 = arith.constant 0 : index
    %c0_0 = arith.constant 0 : index
    %c0_1 = arith.constant 0 : index
    %0 = vector.load %arg2[%c0, %c0_0, %c0_1] : memref<1x256x128xf32, #tpu.memory_space<vmem>>, vector<1x256x128xf32>
    %1 = vector.shape_cast %0 : vector<1x256x128xf32> to vector<256x128xf32>
    %c0_2 = arith.constant 0 : index
    %c0_3 = arith.constant 0 : index
    %2 = vector.load %arg4[%c0_2, %c0_3] : memref<128x128xf32, #tpu.memory_space<vmem>>, vector<128x128xf32>
    %cst = arith.constant dense<0.000000e+00> : vector<256x128xf32>
    %3 = tpu.matmul %1, %2, %cst {dimension_numbers = #tpu.dot_dimension_numbers<[1], [0], [0], [1], [0, 0, 1, 1], [], []>} : vector<256x128xf32>, vector<128x128xf32>, vector<256x128xf32> -> vector<256x128xf32>
    %cst_4 = arith.constant 5.000000e-01 : f32
    %4 = vector.broadcast %cst_4 : f32 to vector<256x128xf32>
    %5 = arith.mulf %4, %3 : vector<256x128xf32>
    %cst_5 = arith.constant 0.707106769 : f32
    %6 = vector.broadcast %cst_5 : f32 to vector<256x128xf32>
    %7 = arith.mulf %3, %6 : vector<256x128xf32>
    %8 = math.erf %7 : vector<256x128xf32>
    %cst_6 = arith.constant 1.000000e+00 : f32
    %9 = vector.broadcast %cst_6 : f32 to vector<256x128xf32>
    %10 = arith.addf %9, %8 : vector<256x128xf32>
    %11 = arith.mulf %5, %10 : vector<256x128xf32>
    %c0_7 = arith.constant 0 : index
    %c0_8 = arith.constant 0 : index
    %c0_9 = arith.constant 0 : index
    %12 = vector.load %arg6[%c0_7, %c0_8, %c0_9] : memref<1x256x128xf32, #tpu.memory_space<vmem>>, vector<1x256x128xf32>
    %13 = vector.shape_cast %12 : vector<1x256x128xf32> to vector<256x128xf32>
    %14 = vector.shape_cast %11 : vector<256x128xf32> to vector<1x256x128xf32>
    tpu.vector_store %arg6[%c0_7, %c0_8, %c0_9], %14 {strides = array<i32>} : memref<1x256x128xf32, #tpu.memory_space<vmem>>, vector<1x256x128xf32>,
    %c0_10 = arith.constant 0 : index
    %c0_11 = arith.constant 0 : index
    %c0_12 = arith.constant 0 : index
    %15 = vector.load %arg3[%c0_10, %c0_11, %c0_12] : memref<1x256x128xf32, #tpu.memory_space<vmem>>, vector<1x256x128xf32>
    %16 = vector.shape_cast %15 : vector<1x256x128xf32> to vector<256x128xf32>
    %c0_13 = arith.constant 0 : index
    %c0_14 = arith.constant 0 : index
    %17 = vector.load %arg5[%c0_13, %c0_14] : memref<128x128xf32, #tpu.memory_space<vmem>>, vector<128x128xf32>
    %cst_15 = arith.constant dense<0.000000e+00> : vector<256x128xf32>
    %18 = tpu.matmul %16, %17, %cst_15 {dimension_numbers = #tpu.dot_dimension_numbers<[1], [0], [0], [1], [0, 0, 1, 1], [], []>} : vector<256x128xf32>, vector<128x128xf32>, vector<256x128xf32> -> vector<256x128xf32>
    %cst_16 = arith.constant 5.000000e-01 : f32
    %19 = vector.broadcast %cst_16 : f32 to vector<256x128xf32>
    %20 = arith.mulf %19, %18 : vector<256x128xf32>
    %cst_17 = arith.constant 0.707106769 : f32
    %21 = vector.broadcast %cst_17 : f32 to vector<256x128xf32>
    %22 = arith.mulf %18, %21 : vector<256x128xf32>
    %23 = math.erf %22 : vector<256x128xf32>
    %cst_18 = arith.constant 1.000000e+00 : f32
    %24 = vector.broadcast %cst_18 : f32 to vector<256x128xf32>
    %25 = arith.addf %24, %23 : vector<256x128xf32>
    %26 = arith.mulf %20, %25 : vector<256x128xf32>
    %c0_19 = arith.constant 0 : index
    %c0_20 = arith.constant 0 : index
    %c0_21 = arith.constant 0 : index
    %27 = vector.load %arg7[%c0_19, %c0_20, %c0_21] : memref<1x256x128xf32, #tpu.memory_space<vmem>>, vector<1x256x128xf32>
    %28 = vector.shape_cast %27 : vector<1x256x128xf32> to vector<256x128xf32>
    %29 = vector.shape_cast %26 : vector<256x128xf32> to vector<1x256x128xf32>
    tpu.vector_store %arg7[%c0_19, %c0_20, %c0_21], %29 {strides = array<i32>} : memref<1x256x128xf32, #tpu.memory_space<vmem>>, vector<1x256x128xf32>,
    return
  }
  func.func @transform_0(%arg0: i32, %arg1: i32) -> (i32, i32, i32) {
    %c0_i32 = arith.constant 0 : i32
    %c0_i32_0 = arith.constant 0 : i32
    return %arg0, %arg1, %c0_i32 : i32, i32, i32
  }
  func.func @transform_1(%arg0: i32, %arg1: i32) -> (i32, i32, i32) {
    %c0_i32 = arith.constant 0 : i32
    %c0_i32_0 = arith.constant 0 : i32
    return %arg0, %arg1, %c0_i32 : i32, i32, i32
  }
  func.func @transform_2(%arg0: i32, %arg1: i32) -> (i32, i32) {
    %c0_i32 = arith.constant 0 : i32
    %c0_i32_0 = arith.constant 0 : i32
    %c0_i32_1 = arith.constant 0 : i32
    return %c0_i32, %c0_i32_0 : i32, i32
  }
  func.func @transform_3(%arg0: i32, %arg1: i32) -> (i32, i32) {
    %c0_i32 = arith.constant 0 : i32
    %c0_i32_0 = arith.constant 0 : i32
    %c0_i32_1 = arith.constant 0 : i32
    return %c0_i32, %c0_i32_0 : i32, i32
  }
  func.func @transform_4(%arg0: i32, %arg1: i32) -> (i32, i32, i32) {
    %c0_i32 = arith.constant 0 : i32
    %c0_i32_0 = arith.constant 0 : i32
    return %arg0, %arg1, %c0_i32 : i32, i32, i32
  }
  func.func @transform_5(%arg0: i32, %arg1: i32) -> (i32, i32, i32) {
    %c0_i32 = arith.constant 0 : i32
    %c0_i32_0 = arith.constant 0 : i32
    return %arg0, %arg1, %c0_i32 : i32, i32, i32
  }
}

</mosaic_0001>

<bundles_post_ra>
// kernel: tpu_custom_call.1
= control target key start
LH: loop header
LB: loop body
LE: loop exit
PB: predicated region body
PF: predicated region fallthrough
CT: control target
= control target key end

     0   :  { %s2893_s0 = inlined_call_operand.hbm [shape: f32[2,256,128], index: 0, kind: input, shape index: {}]   ;;  %s2894_s1 = inlined_call_operand.hbm [shape: f32[2,256,128], index: 1, kind: input, shape index: {}]   ;;  %s2895_s2 = inlined_call_operand.hbm [shape: f32[128,128], index: 2, kind: input, shape index: {}]   ;;  %s2896_s3 = inlined_call_operand.hbm [shape: f32[128,128], index: 3, kind: input, shape index: {}]   ;;  %s2897_s4 = inlined_call_operand.hbm [shape: f32[2,256,128], index: 4, kind: output, shape index: {0}]   ;;  %s2898_s5 = inlined_call_operand.hbm [shape: f32[2,256,128], index: 5, kind: output, shape index: {1}]  }
   0x1   :  { %2903 = sst [smem:[#allocation19_spill]] %s2893_s0 }
   0x2   :  { %2904 = sst [smem:[#allocation20_spill]] %s2894_s1 }
   0x3   :  { %2905 = sst [smem:[#allocation21_spill]] %s2895_s2 }
   0x4   :  { %2906 = sst [smem:[#allocation22_spill]] %s2896_s3 }
   0x5   :  { %11 = vsyncpa [#allocation3], 0 }
   0x6   :  { %13 = vsyncpa [#allocation3 + $0x1], 0 }
   0x7   :  { %14 = vsyncpa [#allocation6], 0 }
   0x8   :  { %16 = vsyncpa [#allocation6 + $0x1], 0 }
   0x9   :  { %17 = vsyncpa [#allocation9], 0 }
   0xa   :  { %18 = vsyncpa [#allocation4], 0 }
   0xb   :  { %20 = vsyncpa [#allocation4 + $0x1], 0 }
   0xc   :  { %21 = vsyncpa [#allocation12], 0 }
   0xd   :  { %23 = vsyncpa [#allocation12 + $0x1], 0  ;;  %s2271_s18 = smov 0   ;;  %s2273_s19 = smov 0  }
   0xe   :  { %s2275_s20 = smov 0   ;;  %s2277_s21 = smov 0  }
   0xf   :  { %s2279_s22 = smov 0   ;;  %s2281_s23 = smov 0  }
  0x10 LB: > { %s2302_s24 = sadd.s32 4294967295, %s2229_s23   ;;  %s1488_s25 = sadd.s32 4294967294, %s2229_s23   ;;  %s2229_s23 = sphi %s2281_s23, %s29_s23   ;;  %s2225_s22 = sphi %s2279_s22, %s2924_s22   ;;  %s2221_s21 = sphi %s2277_s21, %s2923_s21   ;;  %s2217_s20 = sphi %s2275_s20, %s2922_s20   ;;  %s2213_s19 = sphi %s2273_s19, %s2921_s19   ;;  %s2209_s18 = sphi %s2271_s18, %s2920_s18  }
  0x11   : > { %p63_p0 = scmp.ne.s32.totalorder %s2213_s19, %s2209_s18  ;;  %p64_p1 = scmp.eq.s32.totalorder %s2302_s24, 0 }
  0x12   : > { %p159_p2 = scmp.eq.s32.totalorder %s2302_s24, 1  ;;  %p165_p3 = scmp.eq.s32.totalorder %s1488_s25, 1 }
  0x13   : > { %p2311_p4 = por %p64_p1, %p63_p0  ;;  %p1489_p5 = scmp.ge.s32.totalorder %s2229_s23, 1 }
  0x14   : > { %p2316_p6 = por %p165_p3, %p63_p0  ;;  %p200_p7 = scmp.lt.s32.totalorder %s2229_s23, 3 }
  0x15   : > { %s2231_s29 = smov [#allocation7]   ;;  %s2232_s7 = smov [#allocation8]  }
  0x16   : > { %p2321_p8 = pnand %p1489_p5, %p200_p7  ;;  %s212_s30 = sshll.u32 %s2231_s29, 4  ;;  %s213_s30 = int_to_ptr.vmem [resolvable:$true] %s212_s30 }
  0x17   : > { %s225_s8 = sshll.u32 %s2232_s7, 4  ;;  %s2010_s9 = scalar_lea.vmem %s213_s30, 2048  ;;  %s226_s8 = int_to_ptr.vmem [resolvable:$true] %s225_s8 }
  0x18   : > { %p1790_p9 = pneg %p2321_p8  ;;  %p2011_p13 = scmp.ne.s32.totalorder %s213_s30, %s2010_s9 }
  0x19   : > { %p2018_p5 = scmp.lt.s32.totalorder %s213_s30, %s213_s30  ;;  %p2019_p7 = scmp.lt.s32.totalorder %s2010_s9, %s2010_s9 }
  0x1a   : > { %p2330_p11 = pnand %p1790_p9, %p64_p1 }
  0x1b   : > { %p2020_p10 = por %p2019_p7, %p2018_p5 }
  0x1c   : > { %p2001_p12 = pneg %p2330_p11 }
  0x1e   : > { %p2013_p0 = pnand %p2011_p13, %p2001_p12 }
  0x20   : > { %p2014_p3 = pneg %p2013_p0 }
  0x22   : > { %p2021_p9 = pnand %p2020_p10, %p2014_p3 }
  0x24   : > { %2024 = shalt.err (!%p2021_p9)
}
  0x25   : > { %s2899_s10 = smov 128   ;;  %s2901_s11 = smov 8  }
  0x26   : > { %s2911_s2 = sld [smem:[#allocation21_spill]]  ;;  %s2036_s14 = scalar_lea.vmem %s226_s8, 2048 }
  0x27   : > { %p2037_p13 = scmp.ne.s32.totalorder %s226_s8, %s2036_s14  ;;  %p2044_p10 = scmp.lt.s32.totalorder %s226_s8, %s226_s8 }
  0x28   : > { %p2045_p3 = scmp.lt.s32.totalorder %s2036_s14, %s2036_s14 }
  0x29   : > { %p2039_p0 = pnand %p2037_p13, %p2001_p12 }
  0x2a   : > { %p2046_p7 = por %p2045_p3, %p2044_p10 }
  0x2b   : > { %p2040_p5 = pneg %p2039_p0 }
  0x2c   : > { %1793 = dma.hbm_to_vmem [thread:$0]  (!%p2330_p11), %s2911_s2, 2048, %s213_s30, [#allocation6], %s2899_s10, %s2899_s10, %s2901_s11  }
  0x2d   : > { %p2047_p9 = pnand %p2046_p7, %p2040_p5 }
  0x2f   : > { %2050 = shalt.err (!%p2047_p9)
}
  0x30   : > { %s2912_s3 = sld [smem:[#allocation22_spill]]  ;;  %s41_s17 = sadd.s32 1, %s2225_s22 }
  0x31   : > { %s50_s25 = sadd.s32 1, %s2217_s20  ;;  %p43_p12 = scmp.ge.s32.totalorder %s41_s17, 2 }
  0x32   : > { %p57_p13 = scmp.ne.s32.totalorder %s2217_s20, %s2213_s19  ;;  %p58_p0 = scmp.eq.s32.totalorder %s2229_s23, 0 }
  0x33   : > { %p1813_p5 = scmp.lt.s32.totalorder %s2229_s23, 2  ;;  %s2926_s17 = smov (%p43_p12, %s41_s17), 0 }
  0x34   : > { %p59_p10 = por %p58_p0, %p57_p13  ;;  %p2368_p3 = por %p159_p2, %p57_p13 }
  0x35   : > { %s45_s30 = ssub.s32 %s2225_s22, %s2926_s17  ;;  %s239_s6 = sand.u32 1, %s2217_s20  }
  0x36   : > { %1796 = dma.hbm_to_vmem [thread:$0]  (!%p2330_p11), %s2912_s3, 2048, %s226_s8, [#allocation9], %s2899_s10, %s2899_s10, %s2901_s11  }
  0x37   : > { %p48_p7 = scmp.eq.s32.totalorder %s45_s30, 0  ;;  %s2375_s7 = sshll.u32 %s239_s6, 8 }
  0x38   : > { %s1514_s8 = sshll.u32 %s2225_s22, 12  ;;  %s2914_s0 = sld [smem:[#allocation19_spill]] }
  0x39   : > { %s2379_s9 = scalar_select %p48_p7, %s2217_s20, %s50_s25  }
  0x3a   : > { %s243_s15 = scalar_lea.vmem [#allocation2], %s2375_s7  ;;  %p2387_p2 = pnand %p1813_p5, %p59_p10 }
  0x3b   : > { %s252_s16 = sshll.u32 %s243_s15, 4  ;;  %s2916_s1 = sld [smem:[#allocation20_spill]]  ;;  %s253_s16 = int_to_ptr.vmem [resolvable:$true] %s252_s16 }
  0x3c   : > { %s240_s25 = scalar_lea.sflag [#allocation3], %s239_s6  ;;  %p2053_p11 = pneg %p2387_p2 }
  0x3d   : > { %s2064_s12 = scalar_lea.vmem %s253_s16, 4096  ;;  %s2235_s13 = smov [#allocation2]  }
  0x3e   : > { %s251_s14 = scalar_lea.hbm %s2914_s0, %s1514_s8  ;;  %p2065_p9 = scmp.ne.s32.totalorder %s253_s16, %s2064_s12 }
  0x3f   : > { %s2069_s15 = sshll.u32 %s2235_s13, 4  ;;  %s2070_s15 = int_to_ptr.vmem [resolvable:$false] %s2069_s15 }
  0x40   : > { %p2067_p12 = pnand %p2065_p9, %p2053_p11  ;;  %s2071_s0 = scalar_lea.vmem %s2070_s15, 8192 }
  0x41   : > { %s2394_s2 = scalar_lea.hbm %s2916_s1, %s1514_s8  ;;  %p2072_p0 = scmp.lt.s32.totalorder %s253_s16, %s2070_s15 }
  0x42   : > { %p2068_p13 = pneg %p2067_p12  ;;  %p2073_p5 = scmp.lt.s32.totalorder %s2071_s0, %s2064_s12 }
  0x44   : > { %p2074_p10 = por %p2073_p5, %p2072_p0 }
  0x46   : > { %p2075_p7 = pnand %p2074_p10, %p2068_p13 }
  0x48   : > { %2078 = shalt.err (!%p2075_p7)
}
  0x49   : > { %s2917_s11 = smov 8   ;;  %s2918_s6 = smov 128  }
  0x4a   : > { %1800 = dma.hbm_to_vmem [thread:$0]  (!%p2387_p2), %s251_s14, 4096, %s253_s16, %s240_s25, %s2918_s6, %s2918_s6, %s2917_s11  }
  0x4b   : > { %s266_s8 = scalar_lea.vmem [#allocation5], %s2375_s7  ;;  %s262_s1 = sand.u32 1, %s2229_s23  }
  0x4c   : > { %s275_s30 = sshll.u32 %s266_s8, 4  ;;  %s263_s13 = scalar_lea.sflag [#allocation6], %s262_s1  ;;  %s276_s30 = int_to_ptr.vmem [resolvable:$true] %s275_s30 }
  0x4d   : > { %s2092_s3 = scalar_lea.vmem %s276_s30, 4096  ;;  %s2236_s0 = smov [#allocation5]  }
  0x4e   : > { %p2093_p9 = scmp.ne.s32.totalorder %s276_s30, %s2092_s3  ;;  %s2097_s12 = sshll.u32 %s2236_s0, 4  ;;  %s2098_s12 = int_to_ptr.vmem [resolvable:$false] %s2097_s12 }
  0x4f   : > { %s2099_s15 = scalar_lea.vmem %s2098_s12, 8192  ;;  %p2100_p0 = scmp.lt.s32.totalorder %s276_s30, %s2098_s12 }
  0x50   : > { %p2095_p12 = pnand %p2093_p9, %p2053_p11  ;;  %p2101_p5 = scmp.lt.s32.totalorder %s2099_s15, %s2092_s3 }
  0x52   : > { %p2096_p13 = pneg %p2095_p12  ;;  %p2102_p10 = por %p2101_p5, %p2100_p0 }
  0x54   : > { %p2103_p7 = pnand %p2102_p10, %p2096_p13 }
  0x56   : > { %2106 = shalt.err (!%p2103_p7)
}
  0x57   : > { %1803 = dma.hbm_to_vmem [thread:$0]  (!%p2387_p2), %s2394_s2, 4096, %s276_s30, %s263_s13, %s2918_s6, %s2918_s6, %s2917_s11  }
  0x58   : > { %287 = sbr.rel (%p2321_p8) target bundleno = 458 (0x1ca), region = 36  ;;  %s2420_s1 = sand.u32 (!%p2321_p8), 1, %s2213_s19  }
  0x59   : > { %s2423_s3 = sshll.u32 (!%p2321_p8), %s2420_s1, 8  ;;  %s290_s7 = scalar_lea.sflag (!%p2321_p8), [#allocation3], %s2420_s1 }
  0x5a   : > { %s2427_s14 = scalar_lea.vmem (!%p2321_p8), [#allocation2], %s2423_s3 }
  0x5d   : > { %2184 = dma.done.wait (%p2311_p4), %s290_s7, 4096  }
  0x5e   : > { %2186 = vsyncadd (%p2311_p4), %s290_s7, 4294963200  ;;  %s298_s2 = sand.u32 1, %s2302_s24   ;;  %s2435_s10 = scalar_lea.vmem [#allocation5], %s2423_s3 }
  0x5f   : > { %s299_s28 = scalar_lea.sflag [#allocation6], %s298_s2 }
  0x60   : > { %2188 = dma.done.wait (%p2311_p4), %s299_s28, 4096  }
  0x61   : > { %2190 = vsyncadd (%p2311_p4), %s299_s28, 4294963200 }
  0x62   : > { %2192 = dma.done.wait (%p64_p1), [#allocation6], 2048  }
  0x63   : > { %2194 = vsyncadd (%p64_p1), [#allocation6], 4294965248 }
  0x64   : > { %2196 = dma.done.wait (%p64_p1), [#allocation9], 2048  }
  0x65   : > { %2198 = vsyncadd (%p64_p1), [#allocation9], 4294965248  ;;  %v398_v0 = vld [vmem:[#allocation7 + $0x78] sm:$0xff]  ;;  %v397_v2 = vld [vmem:[#allocation7 + $0x70] sm:$0xff]  ;;  %s2550_s24 = scalar_lea.vmem [#allocation10], %s2423_s3  ;;  %s2555_s26 = scalar_lea.vmem [#allocation11], %s2423_s3 }
  0x66   : > { %v863_v1 = vld [vmem:[#allocation8 + $0x78] sm:$0xff]  ;;  %1614 = vmatprep.subr.mxu0 %v398_v0  ;;  %v862_v3 = vld [vmem:[#allocation8 + $0x70] sm:$0xff]  ;;  %v396_v4 = vld [vmem:[#allocation7 + $0x68] sm:$0xff]  ;;  %s1516_s16 = sshll.u32 %s2221_s21, 12  ;;  %s1302_s25 = sshll.u32 %s2550_s24, 4  ;;  %s2807_s25 = int_to_ptr.vmem [resolvable:$true] %s1302_s25 }
  0x67   : > { %1694 = vmatprep.subr.mxu1 %v863_v1  ;;  %1615 = vmatpush3.msra.mxu0 %v398_v0  ;;  %v861_v5 = vld [vmem:[#allocation8 + $0x68] sm:$0xff]  ;;  %v395_v6 = vld [vmem:[#allocation7 + $0x60] sm:$0xff]  ;;  %v394_v8 = vld [vmem:[#allocation7 + $0x58] sm:$0xff]  ;;  %s2802_s6 = scalar_lea.hbm %s2897_s4, %s1516_s16  ;;  %s1320_s8 = sshll.u32 %s2555_s26, 4  ;;  %s2816_s8 = int_to_ptr.vmem [resolvable:$true] %s1320_s8 }
  0x68   : > { %1695 = vmatpush3.msra.mxu1 %v863_v1  ;;  %1616 = vmatprep.subr.mxu0 %v397_v2  ;;  %v860_v7 = vld [vmem:[#allocation8 + $0x60] sm:$0xff]  ;;  %v859_v9 = vld [vmem:[#allocation8 + $0x58] sm:$0xff]  ;;  %v393_v10 = vld [vmem:[#allocation7 + $0x50] sm:$0xff]  ;;  %s2814_s0 = scalar_lea.hbm %s2898_s5, %s1516_s16  ;;  %s1282_s12 = scalar_lea.sflag [#allocation4], %s2420_s1 }
  0x69   : > { %1696 = vmatprep.subr.mxu1 %v862_v3  ;;  %1617 = vmatpush3.msra.mxu0 %v397_v2  ;;  %v858_v11 = vld [vmem:[#allocation8 + $0x50] sm:$0xff]  ;;  %v392_v12 = vld [vmem:[#allocation7 + $0x48] sm:$0xff]  ;;  %v391_v14 = vld [vmem:[#allocation7 + $0x40] sm:$0xff]  ;;  %s2107_s15 = scalar_lea.vmem %s2807_s25, 4096  ;;  %s2237_s3 = smov [#allocation10]  }
  0x6a   : > { %1697 = vmatpush3.msra.mxu1 %v862_v3  ;;  %1618 = vmatprep.subr.mxu0 %v396_v4  ;;  %v857_v13 = vld [vmem:[#allocation8 + $0x48] sm:$0xff]  ;;  %v856_v15 = vld [vmem:[#allocation8 + $0x40] sm:$0xff]  ;;  %v390_v16 = vld [vmem:[#allocation7 + $0x38] sm:$0xff]  ;;  %p2108_p1 = scmp.ne.s32.totalorder %s2807_s25, %s2107_s15  ;;  %s2111_s7 = sshll.u32 %s2237_s3, 4  ;;  %s2112_s7 = int_to_ptr.vmem [resolvable:$false] %s2111_s7 }
  0x6b   : > { %1698 = vmatprep.subr.mxu1 %v861_v5  ;;  %1619 = vmatpush3.msra.mxu0 %v396_v4  ;;  %v855_v17 = vld [vmem:[#allocation8 + $0x38] sm:$0xff]  ;;  %v389_v18 = vld [vmem:[#allocation7 + $0x30] sm:$0xff]  ;;  %v388_v20 = vld [vmem:[#allocation7 + $0x28] sm:$0xff]  ;;  %p2114_p2 = scmp.lt.s32.totalorder %s2807_s25, %s2112_s7 }
  0x6c   : > { %1699 = vmatpush3.msra.mxu1 %v861_v5  ;;  %1620 = vmatprep.subr.mxu0 %v395_v6  ;;  %v854_v19 = vld [vmem:[#allocation8 + $0x30] sm:$0xff]  ;;  %v853_v21 = vld [vmem:[#allocation8 + $0x28] sm:$0xff]  ;;  %v387_v22 = vld [vmem:[#allocation7 + $0x20] sm:$0xff]  ;;  %p2109_p4 = pnand %p2108_p1, %p2368_p3 }
  0x6d   : > { %1700 = vmatprep.subr.mxu1 %v860_v7  ;;  %1621 = vmatpush3.msra.mxu0 %v395_v6  ;;  %v852_v23 = vld [vmem:[#allocation8 + $0x20] sm:$0xff]  ;;  %v386_v24 = vld [vmem:[#allocation7 + $0x18] sm:$0xff]  ;;  %v385_v26 = vld [vmem:[#allocation7 + $0x10] sm:$0xff] }
  0x6e   : > { %1701 = vmatpush3.msra.mxu1 %v860_v7  ;;  %1622 = vmatprep.subr.mxu0 %v394_v8  ;;  %v851_v25 = vld [vmem:[#allocation8 + $0x18] sm:$0xff]  ;;  %v850_v27 = vld [vmem:[#allocation8 + $0x10] sm:$0xff]  ;;  %v384_v28 = vld [vmem:[#allocation7 + $0x8] sm:$0xff]  ;;  %p2110_p8 = pneg %p2109_p4 }
  0x6f   : > { %1702 = vmatprep.subr.mxu1 %v859_v9  ;;  %1623 = vmatpush3.msra.mxu0 %v394_v8  ;;  %v849_v29 = vld [vmem:[#allocation8 + $0x8] sm:$0xff]  ;;  %v383_v30 = vld [vmem:[#allocation7] sm:$0xff]  ;;  %v353_v36 = vld [vmem:[%s2427_s14 + $0x10] sm:$0xff] }
  0x70   : > { %1703 = vmatpush3.msra.mxu1 %v859_v9  ;;  %1624 = vmatprep.subr.mxu0 %v393_v10  ;;  %v848_v31 = vld [vmem:[#allocation8] sm:$0xff]  ;;  %v352_v34 = vld [vmem:[%s2427_s14 + $0x8] sm:$0xff]  ;;  %v818_v37 = vld [vmem:[%s2435_s10 + $0x10] sm:$0xff] }
  0x71   : > { %1704 = vmatprep.subr.mxu1 %v858_v11  ;;  %1625 = vmatpush3.msra.mxu0 %v393_v10  ;;  %v351_v32 = vld [vmem:[%s2427_s14] sm:$0xff]  ;;  %v817_v35 = vld [vmem:[%s2435_s10 + $0x8] sm:$0xff]  ;;  %v354_v38 = vld [vmem:[%s2427_s14 + $0x18] sm:$0xff] }
  0x72   : > { %1705 = vmatpush3.msra.mxu1 %v858_v11  ;;  %1626 = vmatprep.subr.mxu0 %v392_v12  ;;  %v816_v33 = vld [vmem:[%s2435_s10] sm:$0xff]  ;;  %v819_v39 = vld [vmem:[%s2435_s10 + $0x18] sm:$0xff]  ;;  %v356_v42 = vld [vmem:[%s2427_s14 + $0x28] sm:$0xff] }
  0x73   : > { %1706 = vmatprep.subr.mxu1 %v857_v13  ;;  %1627 = vmatpush3.msra.mxu0 %v392_v12  ;;  %v355_v40 = vld [vmem:[%s2427_s14 + $0x20] sm:$0xff]  ;;  %v821_v43 = vld [vmem:[%s2435_s10 + $0x28] sm:$0xff]  ;;  %v357_v44 = vld [vmem:[%s2427_s14 + $0x30] sm:$0xff] }
  0x74   : > { %1707 = vmatpush3.msra.mxu1 %v857_v13  ;;  %1628 = vmatprep.subr.mxu0 %v391_v14  ;;  %v820_v41 = vld [vmem:[%s2435_s10 + $0x20] sm:$0xff]  ;;  %v822_v45 = vld [vmem:[%s2435_s10 + $0x30] sm:$0xff]  ;;  %v358_v46 = vld [vmem:[%s2427_s14 + $0x38] sm:$0xff] }
  0x75   : > { %1708 = vmatprep.subr.mxu1 %v856_v15  ;;  %1629 = vmatpush3.msra.mxu0 %v391_v14  ;;  %v823_v47 = vld [vmem:[%s2435_s10 + $0x38] sm:$0xff]  ;;  %v359_v48 = vld [vmem:[%s2427_s14 + $0x40] sm:$0xff]  ;;  %v360_v50 = vld [vmem:[%s2427_s14 + $0x48] sm:$0xff] }
  0x76   : > { %1709 = vmatpush3.msra.mxu1 %v856_v15  ;;  %1630 = vmatprep.subr.mxu0 %v390_v16  ;;  %v824_v49 = vld [vmem:[%s2435_s10 + $0x40] sm:$0xff]  ;;  %v825_v51 = vld [vmem:[%s2435_s10 + $0x48] sm:$0xff]  ;;  %v361_v52 = vld [vmem:[%s2427_s14 + $0x50] sm:$0xff] }
  0x77   : > { %1710 = vmatprep.subr.mxu1 %v855_v17  ;;  %1631 = vmatpush3.msra.mxu0 %v390_v16  ;;  %v826_v53 = vld [vmem:[%s2435_s10 + $0x50] sm:$0xff]  ;;  %v362_v54 = vld [vmem:[%s2427_s14 + $0x58] sm:$0xff]  ;;  %v363_v56 = vld [vmem:[%s2427_s14 + $0x60] sm:$0xff] }
  0x78   : > { %1711 = vmatpush3.msra.mxu1 %v855_v17  ;;  %1632 = vmatprep.subr.mxu0 %v389_v18  ;;  %v827_v55 = vld [vmem:[%s2435_s10 + $0x58] sm:$0xff]  ;;  %v828_v57 = vld [vmem:[%s2435_s10 + $0x60] sm:$0xff]  ;;  %v364_v58 = vld [vmem:[%s2427_s14 + $0x68] sm:$0xff] }
  0x79   : > { %1712 = vmatprep.subr.mxu1 %v854_v19  ;;  %1633 = vmatpush3.msra.mxu0 %v389_v18  ;;  %v829_v59 = vld [vmem:[%s2435_s10 + $0x68] sm:$0xff]  ;;  %v365_v60 = vld [vmem:[%s2427_s14 + $0x70] sm:$0xff]  ;;  %v366_v62 = vld [vmem:[%s2427_s14 + $0x78] sm:$0xff] }
  0x7a   : > { %1713 = vmatpush3.msra.mxu1 %v854_v19  ;;  %1634 = vmatprep.subr.mxu0 %v388_v20  ;;  %v830_v61 = vld [vmem:[%s2435_s10 + $0x70] sm:$0xff]  ;;  %v831_v63 = vld [vmem:[%s2435_s10 + $0x78] sm:$0xff]  ;;  %v367_v0 = vld [vmem:[%s2427_s14 + $0x80] sm:$0xff] }
  0x7b   : > { %1714 = vmatprep.subr.mxu1 %v853_v21  ;;  %1635 = vmatpush3.msra.mxu0 %v388_v20  ;;  %v832_v1 = vld [vmem:[%s2435_s10 + $0x80] sm:$0xff]  ;;  %v368_v2 = vld [vmem:[%s2427_s14 + $0x88] sm:$0xff]  ;;  %v369_v4 = vld [vmem:[%s2427_s14 + $0x90] sm:$0xff] }
  0x7c   : > { %1715 = vmatpush3.msra.mxu1 %v853_v21  ;;  %1636 = vmatprep.subr.mxu0 %v387_v22  ;;  %v833_v3 = vld [vmem:[%s2435_s10 + $0x88] sm:$0xff]  ;;  %v834_v5 = vld [vmem:[%s2435_s10 + $0x90] sm:$0xff]  ;;  %v370_v6 = vld [vmem:[%s2427_s14 + $0x98] sm:$0xff] }
  0x7d   : > { %1716 = vmatprep.subr.mxu1 %v852_v23  ;;  %1637 = vmatpush3.msra.mxu0 %v387_v22  ;;  %v835_v7 = vld [vmem:[%s2435_s10 + $0x98] sm:$0xff]  ;;  %v371_v8 = vld [vmem:[%s2427_s14 + $0xa0] sm:$0xff]  ;;  %v372_v10 = vld [vmem:[%s2427_s14 + $0xa8] sm:$0xff] }
  0x7e   : > { %1717 = vmatpush3.msra.mxu1 %v852_v23  ;;  %1638 = vmatprep.subr.mxu0 %v386_v24  ;;  %v836_v9 = vld [vmem:[%s2435_s10 + $0xa0] sm:$0xff]  ;;  %v837_v11 = vld [vmem:[%s2435_s10 + $0xa8] sm:$0xff]  ;;  %v373_v12 = vld [vmem:[%s2427_s14 + $0xb0] sm:$0xff] }
  0x7f   : > { %1718 = vmatprep.subr.mxu1 %v851_v25  ;;  %1639 = vmatpush3.msra.mxu0 %v386_v24  ;;  %v838_v13 = vld [vmem:[%s2435_s10 + $0xb0] sm:$0xff]  ;;  %v374_v14 = vld [vmem:[%s2427_s14 + $0xb8] sm:$0xff]  ;;  %v375_v16 = vld [vmem:[%s2427_s14 + $0xc0] sm:$0xff] }
  0x80   : > { %1719 = vmatpush3.msra.mxu1 %v851_v25  ;;  %1640 = vmatprep.subr.mxu0 %v385_v26  ;;  %v839_v15 = vld [vmem:[%s2435_s10 + $0xb8] sm:$0xff]  ;;  %v840_v17 = vld [vmem:[%s2435_s10 + $0xc0] sm:$0xff]  ;;  %v376_v18 = vld [vmem:[%s2427_s14 + $0xc8] sm:$0xff] }
  0x81   : > { %1720 = vmatprep.subr.mxu1 %v850_v27  ;;  %1641 = vmatpush3.msra.mxu0 %v385_v26  ;;  %v841_v19 = vld [vmem:[%s2435_s10 + $0xc8] sm:$0xff]  ;;  %v377_v20 = vld [vmem:[%s2427_s14 + $0xd0] sm:$0xff]  ;;  %v378_v22 = vld [vmem:[%s2427_s14 + $0xd8] sm:$0xff] }
  0x82   : > { %1721 = vmatpush3.msra.mxu1 %v850_v27  ;;  %1642 = vmatprep.subr.mxu0 %v384_v28  ;;  %v842_v21 = vld [vmem:[%s2435_s10 + $0xd0] sm:$0xff]  ;;  %v843_v23 = vld [vmem:[%s2435_s10 + $0xd8] sm:$0xff]  ;;  %v379_v24 = vld [vmem:[%s2427_s14 + $0xe0] sm:$0xff] }
  0x83   : > { %1722 = vmatprep.subr.mxu1 %v849_v29  ;;  %1643 = vmatpush3.msra.mxu0 %v384_v28  ;;  %v844_v25 = vld [vmem:[%s2435_s10 + $0xe0] sm:$0xff]  ;;  %v380_v26 = vld [vmem:[%s2427_s14 + $0xe8] sm:$0xff]  ;;  %v381_v28 = vld [vmem:[%s2427_s14 + $0xf0] sm:$0xff] }
  0x84   : > { %1723 = vmatpush3.msra.mxu1 %v849_v29  ;;  %1644 = vmatprep.subr.mxu0 %v383_v30  ;;  %v845_v27 = vld [vmem:[%s2435_s10 + $0xe8] sm:$0xff]  ;;  %v846_v29 = vld [vmem:[%s2435_s10 + $0xf0] sm:$0xff] }
  0x85   : > { %1724 = vmatprep.subr.mxu1 %v848_v31  ;;  %1645 = vmatpush3.msra.mxu0 %v383_v30  ;;  %v382_v30 = vld [vmem:[%s2427_s14 + $0xf8] sm:$0xff]  ;;  %s2113_s14 = scalar_lea.vmem %s2112_s7, 8192 }
  0x86   : > { %1646 = vmatprep.mubr.f32.mxu0 %v351_v32  ;;  %1725 = vmatpush3.msra.mxu1 %v848_v31  ;;  %v847_v31 = vld [vmem:[%s2435_s10 + $0xf8] sm:$0xff]  ;;  %p2115_p11 = scmp.lt.s32.totalorder %s2113_s14, %s2107_s15 }
  0x87   : > { %1726 = vmatprep.mubr.f32.mxu1 %v816_v33  ;;  %1647 = vmatmul.mubr.f32.vlgmr.msra.gmra.mxu0 %v352_v34 }
  0x88   : > { %1727 = vmatmul.mubr.f32.vlgmr.msra.gmra.mxu1 %v817_v35  ;;  %1649 = vmatprep.mubr.f32.mxu0 %v353_v36  ;;  %p2116_p9 = por %p2115_p11, %p2114_p2 }
  0x89   : > { %1729 = vmatprep.mubr.f32.mxu1 %v818_v37 }
  0x8a   : > { %p2117_p12 = pnand %p2116_p9, %p2110_p8 }
  0x8b   : > { %1650 = vmatmul.mubr.f32.gmra.mxu0 %v354_v38 }
  0x8c   : > { %1730 = vmatmul.mubr.f32.gmra.mxu1 %v819_v39  ;;  %1652 = vmatprep.mubr.f32.mxu0 %v355_v40 }
  0x8d   : > { %1732 = vmatprep.mubr.f32.mxu1 %v820_v41 }
  0x8f   : > { %1653 = vmatmul.mubr.f32.gmra.mxu0 %v356_v42 }
  0x90   : > { %1733 = vmatmul.mubr.f32.gmra.mxu1 %v821_v43  ;;  %1655 = vmatprep.mubr.f32.mxu0 %v357_v44 }
  0x91   : > { %1735 = vmatprep.mubr.f32.mxu1 %v822_v45 }
  0x93   : > { %1656 = vmatmul.mubr.f32.gmra.mxu0 %v358_v46 }
  0x94   : > { %1736 = vmatmul.mubr.f32.gmra.mxu1 %v823_v47  ;;  %1658 = vmatprep.mubr.f32.mxu0 %v359_v48 }
  0x95   : > { %1738 = vmatprep.mubr.f32.mxu1 %v824_v49 }
  0x97   : > { %1659 = vmatmul.mubr.f32.gmra.mxu0 %v360_v50 }
  0x98   : > { %1739 = vmatmul.mubr.f32.gmra.mxu1 %v825_v51  ;;  %1661 = vmatprep.mubr.f32.mxu0 %v361_v52 }
  0x99   : > { %1741 = vmatprep.mubr.f32.mxu1 %v826_v53 }
  0x9b   : > { %1662 = vmatmul.mubr.f32.gmra.mxu0 %v362_v54 }
  0x9c   : > { %1742 = vmatmul.mubr.f32.gmra.mxu1 %v827_v55  ;;  %1664 = vmatprep.mubr.f32.mxu0 %v363_v56 }
  0x9d   : > { %1744 = vmatprep.mubr.f32.mxu1 %v828_v57 }
  0x9f   : > { %1665 = vmatmul.mubr.f32.gmra.mxu0 %v364_v58 }
  0xa0   : > { %1745 = vmatmul.mubr.f32.gmra.mxu1 %v829_v59  ;;  %1667 = vmatprep.mubr.f32.mxu0 %v365_v60 }
  0xa1   : > { %1747 = vmatprep.mubr.f32.mxu1 %v830_v61 }
  0xa3   : > { %1668 = vmatmul.mubr.f32.gmra.mxu0 %v366_v62 }
  0xa4   : > { %1748 = vmatmul.mubr.f32.gmra.mxu1 %v831_v63  ;;  %1670 = vmatprep.mubr.f32.mxu0 %v367_v0 }
  0xa5   : > { %1750 = vmatprep.mubr.f32.mxu1 %v832_v1 }
  0xa7   : > { %1671 = vmatmul.mubr.f32.gmra.mxu0 %v368_v2 }
  0xa8   : > { %1751 = vmatmul.mubr.f32.gmra.mxu1 %v833_v3  ;;  %1673 = vmatprep.mubr.f32.mxu0 %v369_v4 }
  0xa9   : > { %1753 = vmatprep.mubr.f32.mxu1 %v834_v5 }
  0xab   : > { %1674 = vmatmul.mubr.f32.gmra.mxu0 %v370_v6 }
  0xac   : > { %1754 = vmatmul.mubr.f32.gmra.mxu1 %v835_v7  ;;  %1676 = vmatprep.mubr.f32.mxu0 %v371_v8 }
  0xad   : > { %1756 = vmatprep.mubr.f32.mxu1 %v836_v9 }
  0xaf   : > { %1677 = vmatmul.mubr.f32.gmra.mxu0 %v372_v10 }
  0xb0   : > { %1757 = vmatmul.mubr.f32.gmra.mxu1 %v837_v11  ;;  %1679 = vmatprep.mubr.f32.mxu0 %v373_v12 }
  0xb1   : > { %1759 = vmatprep.mubr.f32.mxu1 %v838_v13 }
  0xb3   : > { %1680 = vmatmul.mubr.f32.gmra.mxu0 %v374_v14 }
  0xb4   : > { %1760 = vmatmul.mubr.f32.gmra.mxu1 %v839_v15  ;;  %1682 = vmatprep.mubr.f32.mxu0 %v375_v16 }
  0xb5   : > { %1762 = vmatprep.mubr.f32.mxu1 %v840_v17 }
  0xb7   : > { %1683 = vmatmul.mubr.f32.gmra.mxu0 %v376_v18 }
  0xb8   : > { %1763 = vmatmul.mubr.f32.gmra.mxu1 %v841_v19  ;;  %1685 = vmatprep.mubr.f32.mxu0 %v377_v20 }
  0xb9   : > { %1765 = vmatprep.mubr.f32.mxu1 %v842_v21 }
  0xbb   : > { %1686 = vmatmul.mubr.f32.gmra.mxu0 %v378_v22 }
  0xbc   : > { %1766 = vmatmul.mubr.f32.gmra.mxu1 %v843_v23  ;;  %1688 = vmatprep.mubr.f32.mxu0 %v379_v24 }
  0xbd   : > { %1768 = vmatprep.mubr.f32.mxu1 %v844_v25 }
  0xbf   : > { %1689 = vmatmul.mubr.f32.gmra.mxu0 %v380_v26 }
  0xc0   : > { %1769 = vmatmul.mubr.f32.gmra.mxu1 %v845_v27  ;;  %1691 = vmatprep.mubr.f32.mxu0 %v381_v28 }
  0xc1   : > { %1771 = vmatprep.mubr.f32.mxu1 %v846_v29 }
  0xc3   : > { %1692 = vmatmul.mubr.f32.gmra.mxu0 %v382_v30 }
  0xc4   : > { %1772 = vmatmul.mubr.f32.gmra.mxu1 %v847_v31 }
 0x147   : > { %v1648_v32 = vpop.f32.mrf.mxu0 }
 0x148   : > { %v1728_v33 = vpop.f32.mrf.mxu1  ;;  %v657_v34 = vmul.f32 0.70710677, %v1648_v32  ;;  %v625_v59 = vmul.f32 0.5, %v1648_v32 }
 0x149   : > { %v1122_v35 = vmul.f32 0.70710677, %v1728_v33  ;;  %v465_v36 = vpop.f32.mrf.mxu0  ;;  %v1090_v63 = vmul.f32 0.5, %v1728_v33 }
 0x14a   : > { %v930_v37 = vpop.f32.mrf.mxu1  ;;  %1871 = verf.f32 %v657_v34  ;;  %v656_v38 = vmul.f32 0.70710677, %v465_v36  ;;  %v624_v0 = vmul.f32 0.5, %v465_v36 }
 0x14b   : > { %1873 = verf.f32 %v1122_v35  ;;  %v1121_v39 = vmul.f32 0.70710677, %v930_v37  ;;  %v1651_v40 = vpop.f32.mrf.mxu0  ;;  %v1089_v3 = vmul.f32 0.5, %v930_v37 }
 0x14c   : > { %v1731_v41 = vpop.f32.mrf.mxu1  ;;  %1875 = verf.f32 %v656_v38  ;;  %v659_v42 = vmul.f32 0.70710677, %v1651_v40  ;;  %v627_v4 = vmul.f32 0.5, %v1651_v40 }
 0x14d   : > { %1877 = verf.f32 %v1121_v39  ;;  %v1124_v43 = vmul.f32 0.70710677, %v1731_v41  ;;  %v475_v44 = vpop.f32.mrf.mxu0  ;;  %v1092_v10 = vmul.f32 0.5, %v1731_v41 }
 0x14e   : > { %v940_v45 = vpop.f32.mrf.mxu1  ;;  %1879 = verf.f32 %v659_v42  ;;  %v658_v46 = vmul.f32 0.70710677, %v475_v44  ;;  %v626_v14 = vmul.f32 0.5, %v475_v44 }
 0x14f   : > { %1881 = verf.f32 %v1124_v43  ;;  %v1123_v47 = vmul.f32 0.70710677, %v940_v45  ;;  %v1654_v48 = vpop.f32.mrf.mxu0  ;;  %v1091_v21 = vmul.f32 0.5, %v940_v45 }
 0x150   : > { %v2513_v49 = vpop.f32.mrf.mxu1  ;;  %1883 = verf.f32 %v658_v46  ;;  %v661_v50 = vmul.f32 0.70710677, %v1654_v48  ;;  %v629_v31 = vmul.f32 0.5, %v1654_v48 }
 0x151   : > { %1885 = verf.f32 %v1123_v47  ;;  %v1126_v51 = vmul.f32 0.70710677, %v2513_v49  ;;  %v2516_v52 = vpop.f32.mrf.mxu0  ;;  %v1094_v36 = vmul.f32 0.5, %v2513_v49 }
 0x152   : > { %v2518_v53 = vpop.f32.mrf.mxu1  ;;  %1887 = verf.f32 %v661_v50  ;;  %v660_v54 = vmul.f32 0.70710677, %v2516_v52  ;;  %v628_v46 = vmul.f32 0.5, %v2516_v52 }
 0x153   : > { %1889 = verf.f32 %v1126_v51  ;;  %v1125_v55 = vmul.f32 0.70710677, %v2518_v53  ;;  %v2522_v56 = vpop.f32.mrf.mxu0 }
 0x154   : > { %v2524_v57 = vpop.f32.mrf.mxu1  ;;  %1891 = verf.f32 %v660_v54  ;;  %v663_v58 = vmul.f32 0.70710677, %v2522_v56 }
 0x155   : > { %1893 = verf.f32 %v1125_v55  ;;  %v1128_v60 = vmul.f32 0.70710677, %v2524_v57  ;;  %v2528_v61 = vpop.f32.mrf.mxu0  ;;  %v1093_v55 = vmul.f32 0.5, %v2518_v53  ;;  %v631_v53 = vmul.f32 0.5, %v2522_v56 }
 0x156   : > { %v2530_v62 = vpop.f32.mrf.mxu1  ;;  %1895 = verf.f32 %v663_v58  ;;  %v662_v1 = vmul.f32 0.70710677, %v2528_v61 }
 0x157   : > { %v1872_v2 = vpop.eup %1871  ;;  %1897 = verf.f32 %v1128_v60  ;;  %v1127_v5 = vmul.f32 0.70710677, %v2530_v62  ;;  %v2534_v6 = vpop.f32.mrf.mxu0 }
 0x158   : > { %v2536_v7 = vpop.f32.mrf.mxu1  ;;  %v1874_v8 = vpop.eup %1873  ;;  %v721_v9 = vadd.f32 1.0, %v1872_v2  ;;  %1899 = verf.f32 %v662_v1  ;;  %v665_v11 = vmul.f32 0.70710677, %v2534_v6 }
 0x159   : > { %v1876_v12 = vpop.eup %1875  ;;  %v1186_v13 = vadd.f32 1.0, %v1874_v8  ;;  %1901 = verf.f32 %v1127_v5  ;;  %v1130_v15 = vmul.f32 0.70710677, %v2536_v7  ;;  %v2540_v16 = vpop.f32.mrf.mxu0 }
 0x15a   : > { %v2542_v17 = vpop.f32.mrf.mxu1  ;;  %v1878_v18 = vpop.eup %1877  ;;  %v753_v19 = vmul.f32 %v721_v9, %v625_v59  ;;  %v720_v20 = vadd.f32 1.0, %v1876_v12  ;;  %1903 = verf.f32 %v665_v11  ;;  %v664_v25 = vmul.f32 0.70710677, %v2540_v16 }
 0x15b   : > { %v1880_v22 = vpop.eup %1879  ;;  %v1218_v23 = vmul.f32 %v1186_v13, %v1090_v63  ;;  %v1185_v24 = vadd.f32 1.0, %v1878_v18  ;;  %1905 = verf.f32 %v1130_v15  ;;  %v2545_v26 = vpop.f32.mrf.mxu0  ;;  %v1129_v32 = vmul.f32 0.70710677, %v2542_v17 }
 0x15c   : > { %v2547_v27 = vpop.f32.mrf.mxu1  ;;  %v1882_v28 = vpop.eup %1881  ;;  %785 = vst [vmem:[%s2550_s24 + $0x8] sm:$0xff] %v753_v19  ;;  %v752_v29 = vmul.f32 %v720_v20, %v624_v0  ;;  %v723_v30 = vadd.f32 1.0, %v1880_v22  ;;  %1907 = verf.f32 %v664_v25  ;;  %v667_v42 = vmul.f32 0.70710677, %v2545_v26 }
 0x15d   : > { %v1884_v33 = vpop.eup %1883  ;;  %1250 = vst [vmem:[%s2555_s26 + $0x8] sm:$0xff] %v1218_v23  ;;  %v1217_v34 = vmul.f32 %v1185_v24, %v1089_v3  ;;  %v1188_v35 = vadd.f32 1.0, %v1882_v28  ;;  %v2559_v37 = vpop.f32.mrf.mxu0  ;;  %1909 = verf.f32 %v1129_v32  ;;  %v1132_v47 = vmul.f32 0.70710677, %v2547_v27 }
 0x15e   : > { %v2561_v38 = vpop.f32.mrf.mxu1  ;;  %v1886_v39 = vpop.eup %1885  ;;  %784 = vst [vmem:[%s2550_s24] sm:$0xff] %v752_v29  ;;  %v755_v40 = vmul.f32 %v723_v30, %v627_v4  ;;  %v722_v41 = vadd.f32 1.0, %v1884_v33  ;;  %1911 = verf.f32 %v667_v42  ;;  %v666_v52 = vmul.f32 0.70710677, %v2559_v37 }
 0x15f   : > { %v1888_v43 = vpop.eup %1887  ;;  %1249 = vst [vmem:[%s2555_s26] sm:$0xff] %v1217_v34  ;;  %v1220_v44 = vmul.f32 %v1188_v35, %v1092_v10  ;;  %v1187_v45 = vadd.f32 1.0, %v1886_v39  ;;  %v2568_v48 = vpop.f32.mrf.mxu0  ;;  %1913 = verf.f32 %v1132_v47  ;;  %v1131_v4 = vmul.f32 0.70710677, %v2561_v38 }
 0x160   : > { %v2570_v49 = vpop.f32.mrf.mxu1  ;;  %v1890_v50 = vpop.eup %1889  ;;  %787 = vst [vmem:[%s2550_s24 + $0x18] sm:$0xff] %v755_v40  ;;  %v754_v51 = vmul.f32 %v722_v41, %v626_v14  ;;  %v725_v54 = vadd.f32 1.0, %v1888_v43  ;;  %v1096_v10 = vmul.f32 0.5, %v2524_v57  ;;  %1915 = verf.f32 %v666_v52 }
 0x161   : > { %v1892_v58 = vpop.eup %1891  ;;  %1252 = vst [vmem:[%s2555_s26 + $0x18] sm:$0xff] %v1220_v44  ;;  %v1219_v59 = vmul.f32 %v1187_v45, %v1091_v21  ;;  %v1190_v60 = vadd.f32 1.0, %v1890_v50  ;;  %v2576_v63 = vpop.f32.mrf.mxu0  ;;  %1917 = verf.f32 %v1131_v4  ;;  %v669_v56 = vmul.f32 0.70710677, %v2568_v48 }
 0x162   : > { %v2578_v0 = vpop.f32.mrf.mxu1  ;;  %v1894_v1 = vpop.eup %1893  ;;  %786 = vst [vmem:[%s2550_s24 + $0x10] sm:$0xff] %v754_v51  ;;  %v757_v2 = vmul.f32 %v725_v54, %v629_v31  ;;  %v724_v3 = vadd.f32 1.0, %v1892_v58  ;;  %v630_v57 = vmul.f32 0.5, %v2528_v61  ;;  %v1134_v21 = vmul.f32 0.70710677, %v2570_v49 }
 0x163   : > { %v1896_v5 = vpop.eup %1895  ;;  %1251 = vst [vmem:[%s2555_s26 + $0x10] sm:$0xff] %v1219_v59  ;;  %v1222_v8 = vmul.f32 %v1190_v60, %v1094_v36  ;;  %v1189_v9 = vadd.f32 1.0, %v1894_v1  ;;  %v2585_v11 = vpop.f32.mrf.mxu0  ;;  %v1095_v29 = vmul.f32 0.5, %v2530_v62  ;;  %1919 = verf.f32 %v669_v56 }
 0x164   : > { %v2587_v12 = vpop.f32.mrf.mxu1  ;;  %v1898_v13 = vpop.eup %1897  ;;  %789 = vst [vmem:[%s2550_s24 + $0x28] sm:$0xff] %v757_v2  ;;  %v756_v14 = vmul.f32 %v724_v3, %v628_v46  ;;  %v727_v15 = vadd.f32 1.0, %v1896_v5  ;;  %1921 = verf.f32 %v1134_v21  ;;  %v668_v61 = vmul.f32 0.70710677, %v2576_v63 }
 0x165   : > { %v1900_v18 = vpop.eup %1899  ;;  %1254 = vst [vmem:[%s2555_s26 + $0x28] sm:$0xff] %v1222_v8  ;;  %v1221_v19 = vmul.f32 %v1189_v9, %v1093_v55  ;;  %v1192_v20 = vadd.f32 1.0, %v1898_v13  ;;  %v2594_v22 = vpop.f32.mrf.mxu0  ;;  %v633_v39 = vmul.f32 0.5, %v2534_v6  ;;  %v1133_v40 = vmul.f32 0.70710677, %v2578_v0 }
 0x166   : > { %v2596_v23 = vpop.f32.mrf.mxu1  ;;  %v1902_v24 = vpop.eup %1901  ;;  %788 = vst [vmem:[%s2550_s24 + $0x20] sm:$0xff] %v756_v14  ;;  %v759_v25 = vmul.f32 %v727_v15, %v631_v53  ;;  %v726_v28 = vadd.f32 1.0, %v1900_v18  ;;  %v1098_v42 = vmul.f32 0.5, %v2536_v7  ;;  %1923 = verf.f32 %v668_v61 }
 0x167   : > { %v1904_v30 = vpop.eup %1903  ;;  %1253 = vst [vmem:[%s2555_s26 + $0x20] sm:$0xff] %v1221_v19  ;;  %v1224_v31 = vmul.f32 %v1192_v20, %v1096_v10  ;;  %v1191_v32 = vadd.f32 1.0, %v1902_v24  ;;  %v2602_v33 = vpop.f32.mrf.mxu0  ;;  %1925 = verf.f32 %v1133_v40  ;;  %v671_v6 = vmul.f32 0.70710677, %v2585_v11 }
 0x168   : > { %v2604_v34 = vpop.f32.mrf.mxu1  ;;  %v1906_v35 = vpop.eup %1905  ;;  %791 = vst [vmem:[%s2550_s24 + $0x38] sm:$0xff] %v759_v25  ;;  %v758_v36 = vmul.f32 %v726_v28, %v630_v57  ;;  %v729_v62 = vadd.f32 1.0, %v1904_v30  ;;  %v632_v54 = vmul.f32 0.5, %v2540_v16  ;;  %v1136_v55 = vmul.f32 0.70710677, %v2587_v12 }
 0x169   : > { %1256 = vst [vmem:[%s2555_s26 + $0x38] sm:$0xff] %v1224_v31  ;;  %v1223_v41 = vmul.f32 %v1191_v32, %v1095_v29  ;;  %v1194_v43 = vadd.f32 1.0, %v1906_v35  ;;  %v2611_v44 = vpop.f32.mrf.mxu0  ;;  %v1908_v46 = vpop.eup %1907  ;;  %v1097_v60 = vmul.f32 0.5, %v2542_v17  ;;  %1927 = verf.f32 %v671_v6 }
 0x16a   : > { %v2613_v45 = vpop.f32.mrf.mxu1  ;;  %790 = vst [vmem:[%s2550_s24 + $0x30] sm:$0xff] %v758_v36  ;;  %v761_v47 = vmul.f32 %v729_v62, %v633_v39  ;;  %v1910_v50 = vpop.eup %1909  ;;  %v728_v7 = vadd.f32 1.0, %v1908_v46  ;;  %v670_v1 = vmul.f32 0.70710677, %v2594_v22  ;;  %v635_v16 = vmul.f32 0.5, %v2545_v26 }
 0x16b   : > { %1255 = vst [vmem:[%s2555_s26 + $0x30] sm:$0xff] %v1223_v41  ;;  %v1226_v51 = vmul.f32 %v1194_v43, %v1098_v42  ;;  %v2620_v58 = vpop.f32.mrf.mxu0  ;;  %v1193_v52 = vadd.f32 1.0, %v1910_v50  ;;  %v1912_v2 = vpop.eup %1911  ;;  %1929 = verf.f32 %v1136_v55  ;;  %v1135_v53 = vmul.f32 0.70710677, %v2596_v23 }
 0x16c   : > { %v2622_v59 = vpop.f32.mrf.mxu1  ;;  %793 = vst [vmem:[%s2550_s24 + $0x48] sm:$0xff] %v761_v47  ;;  %v760_v3 = vmul.f32 %v728_v7, %v632_v54  ;;  %v1914_v8 = vpop.eup %1913  ;;  %v731_v9 = vadd.f32 1.0, %v1912_v2  ;;  %1931 = verf.f32 %v670_v1  ;;  %v673_v10 = vmul.f32 0.70710677, %v2602_v33 }
 0x16d   : > { %1258 = vst [vmem:[%s2555_s26 + $0x48] sm:$0xff] %v1226_v51  ;;  %v2630_v4 = vpop.f32.mrf.mxu0  ;;  %v1225_v17 = vmul.f32 %v1193_v52, %v1097_v60  ;;  %v1100_v13 = vmul.f32 0.5, %v2547_v27  ;;  %v1196_v14 = vadd.f32 1.0, %v1914_v8  ;;  %1933 = verf.f32 %v1135_v53  ;;  %v1916_v18 = vpop.eup %1915 }
 0x16e   : > { %v2632_v5 = vpop.f32.mrf.mxu1  ;;  %792 = vst [vmem:[%s2550_s24 + $0x40] sm:$0xff] %v760_v3  ;;  %v1138_v26 = vmul.f32 0.70710677, %v2604_v34  ;;  %v763_v19 = vmul.f32 %v731_v9, %v635_v16  ;;  %v634_v20 = vmul.f32 0.5, %v2559_v37  ;;  %1935 = verf.f32 %v673_v10  ;;  %v1918_v21 = vpop.eup %1917 }
 0x16f   : > { %v2638_v15 = vpop.f32.mrf.mxu0  ;;  %1257 = vst [vmem:[%s2555_s26 + $0x40] sm:$0xff] %v1225_v17  ;;  %v672_v57 = vmul.f32 0.70710677, %v2611_v44  ;;  %v1228_v27 = vmul.f32 %v1196_v14, %v1100_v13  ;;  %v730_v24 = vadd.f32 1.0, %v1916_v18  ;;  %v1099_v25 = vmul.f32 0.5, %v2561_v38 }
 0x170   : > { %v2640_v56 = vpop.f32.mrf.mxu1  ;;  %1937 = verf.f32 %v1138_v26  ;;  %795 = vst [vmem:[%s2550_s24 + $0x58] sm:$0xff] %v763_v19  ;;  %v1195_v30 = vadd.f32 1.0, %v1918_v21  ;;  %v637_v31 = vmul.f32 0.5, %v2568_v48  ;;  %v1137_v37 = vmul.f32 0.70710677, %v2613_v45  ;;  %v1920_v32 = vpop.eup %1919 }
 0x171   : > { %v2646_v28 = vpop.f32.mrf.mxu0  ;;  %1939 = verf.f32 %v672_v57  ;;  %1260 = vst [vmem:[%s2555_s26 + $0x58] sm:$0xff] %v1228_v27  ;;  %v762_v61 = vmul.f32 %v730_v24, %v634_v20  ;;  %v1102_v35 = vmul.f32 0.5, %v2570_v49  ;;  %v675_v38 = vmul.f32 0.70710677, %v2620_v58  ;;  %v1922_v40 = vpop.eup %1921 }
 0x172   : > { %v2648_v29 = vpop.f32.mrf.mxu1  ;;  %v1140_v36 = vmul.f32 0.70710677, %v2622_v59  ;;  %v1227_v48 = vmul.f32 %v1195_v30, %v1099_v25  ;;  %v733_v41 = vadd.f32 1.0, %v1920_v32  ;;  %v636_v42 = vmul.f32 0.5, %v2576_v63 }
 0x173   : > { %v2657_v39 = vpop.f32.mrf.mxu0  ;;  %1941 = verf.f32 %v1137_v37  ;;  %794 = vst [vmem:[%s2550_s24 + $0x50] sm:$0xff] %v762_v61  ;;  %v1198_v43 = vadd.f32 1.0, %v1922_v40  ;;  %v1101_v46 = vmul.f32 0.5, %v2578_v0  ;;  %v674_v49 = vmul.f32 0.70710677, %v2630_v4  ;;  %v1924_v50 = vpop.eup %1923 }
 0x174   : > { %v2659_v62 = vpop.f32.mrf.mxu1  ;;  %1943 = verf.f32 %v675_v38  ;;  %1259 = vst [vmem:[%s2555_s26 + $0x50] sm:$0xff] %v1227_v48  ;;  %v765_v51 = vmul.f32 %v733_v41, %v637_v31  ;;  %v639_v54 = vmul.f32 0.5, %v2585_v11  ;;  %v1139_v63 = vmul.f32 0.70710677, %v2632_v5  ;;  %v1926_v7 = vpop.eup %1925 }
 0x175   : > { %v2665_v47 = vpop.f32.mrf.mxu0  ;;  %1945 = verf.f32 %v1140_v36  ;;  %v1230_v55 = vmul.f32 %v1198_v43, %v1102_v35  ;;  %v732_v0 = vadd.f32 1.0, %v1924_v50  ;;  %v677_v60 = vmul.f32 0.70710677, %v2638_v15 }
 0x176   : > { %v2667_v6 = vpop.f32.mrf.mxu1  ;;  %1947 = verf.f32 %v674_v49  ;;  %797 = vst [vmem:[%s2550_s24 + $0x68] sm:$0xff] %v765_v51  ;;  %v1197_v2 = vadd.f32 1.0, %v1926_v7  ;;  %v1104_v3 = vmul.f32 0.5, %v2587_v12  ;;  %v1142_v11 = vmul.f32 0.70710677, %v2640_v56  ;;  %v1928_v16 = vpop.eup %1927 }
 0x177   : > { %v2673_v52 = vpop.f32.mrf.mxu0  ;;  %1949 = verf.f32 %v1139_v63  ;;  %1262 = vst [vmem:[%s2555_s26 + $0x68] sm:$0xff] %v1230_v55  ;;  %v764_v53 = vmul.f32 %v732_v0, %v636_v42  ;;  %v638_v8 = vmul.f32 0.5, %v2594_v22  ;;  %v676_v17 = vmul.f32 0.70710677, %v2646_v28 }
 0x178   : > { %v2675_v1 = vpop.f32.mrf.mxu1  ;;  %1951 = verf.f32 %v677_v60  ;;  %v1930_v13 = vpop.eup %1929  ;;  %v1229_v14 = vmul.f32 %v1197_v2, %v1101_v46  ;;  %v735_v12 = vadd.f32 1.0, %v1928_v16  ;;  %v1103_v26 = vmul.f32 0.5, %v2596_v23 }
 0x179   : > { %v2683_v9 = vpop.f32.mrf.mxu0  ;;  %1953 = verf.f32 %v1142_v11  ;;  %v1932_v18 = vpop.eup %1931  ;;  %796 = vst [vmem:[%s2550_s24 + $0x60] sm:$0xff] %v764_v53  ;;  %v1200_v19 = vadd.f32 1.0, %v1930_v13  ;;  %v641_v20 = vmul.f32 0.5, %v2602_v33  ;;  %v1141_v22 = vmul.f32 0.70710677, %v2648_v29 }
 0x17a   : > { %v2685_v10 = vpop.f32.mrf.mxu1  ;;  %1955 = verf.f32 %v676_v17  ;;  %v1934_v57 = vpop.eup %1933  ;;  %1261 = vst [vmem:[%s2555_s26 + $0x60] sm:$0xff] %v1229_v14  ;;  %v767_v21 = vmul.f32 %v735_v12, %v639_v54  ;;  %v734_v27 = vadd.f32 1.0, %v1932_v18  ;;  %v1106_v24 = vmul.f32 0.5, %v2604_v34 }
 0x17b   : > { %v679_v25 = vmul.f32 0.70710677, %v2657_v39  ;;  %v2694_v23 = vpop.f32.mrf.mxu0  ;;  %v1936_v30 = vpop.eup %1935  ;;  %v1232_v31 = vmul.f32 %v1200_v19, %v1104_v3  ;;  %v1199_v37 = vadd.f32 1.0, %v1934_v57  ;;  %1957 = verf.f32 %v1141_v22 }
 0x17c   : > { %v1144_v33 = vmul.f32 0.70710677, %v2659_v62  ;;  %v2697_v32 = vpop.f32.mrf.mxu1  ;;  %799 = vst [vmem:[%s2550_s24 + $0x78] sm:$0xff] %v767_v21  ;;  %v766_v35 = vmul.f32 %v734_v27, %v638_v8  ;;  %v737_v38 = vadd.f32 1.0, %v1936_v30  ;;  %v640_v34 = vmul.f32 0.5, %v2611_v44 }
 0x17d   : > { %v1938_v61 = vpop.eup %1937  ;;  %1959 = verf.f32 %v679_v25  ;;  %1264 = vst [vmem:[%s2555_s26 + $0x78] sm:$0xff] %v1232_v31  ;;  %v1231_v40 = vmul.f32 %v1199_v37, %v1103_v26  ;;  %v678_v41 = vmul.f32 0.70710677, %v2665_v47  ;;  %v1105_v46 = vmul.f32 0.5, %v2613_v45  ;;  %v2706_v50 = vpop.f32.mrf.mxu0 }
 0x17e   : > { %v1940_v36 = vpop.eup %1939  ;;  %v1202_v48 = vadd.f32 1.0, %v1938_v61  ;;  %1961 = verf.f32 %v1144_v33  ;;  %798 = vst [vmem:[%s2550_s24 + $0x70] sm:$0xff] %v766_v35  ;;  %v769_v42 = vmul.f32 %v737_v38, %v641_v20  ;;  %v1143_v49 = vmul.f32 0.70710677, %v2667_v6  ;;  %v2711_v7 = vpop.f32.mrf.mxu1 }
 0x17f   : > { %v736_v43 = vadd.f32 1.0, %v1940_v36  ;;  %1263 = vst [vmem:[%s2555_s26 + $0x70] sm:$0xff] %v1231_v40  ;;  %v643_v54 = vmul.f32 0.5, %v2620_v58  ;;  %1963 = verf.f32 %v678_v41  ;;  %v681_v63 = vmul.f32 0.70710677, %v2673_v52 }
 0x180   : > { %v1942_v44 = vpop.eup %1941  ;;  %v1234_v51 = vmul.f32 %v1202_v48, %v1106_v24  ;;  %801 = vst [vmem:[%s2550_s24 + $0x88] sm:$0xff] %v769_v42  ;;  %v1108_v60 = vmul.f32 0.5, %v2622_v59  ;;  %1965 = verf.f32 %v1143_v49  ;;  %v642_v11 = vmul.f32 0.5, %v2630_v4  ;;  %v2721_v59 = vpop.f32.mrf.mxu0 }
 0x181   : > { %v1944_v55 = vpop.eup %1943  ;;  %v768_v0 = vmul.f32 %v736_v43, %v640_v34  ;;  %v1201_v45 = vadd.f32 1.0, %v1942_v44  ;;  %1967 = verf.f32 %v681_v63  ;;  %v1146_v58 = vmul.f32 0.70710677, %v2675_v1  ;;  %v2724_v18 = vpop.f32.mrf.mxu1 }
 0x182   : > { %v1946_v2 = vpop.eup %1945  ;;  %1266 = vst [vmem:[%s2555_s26 + $0x88] sm:$0xff] %v1234_v51  ;;  %v739_v3 = vadd.f32 1.0, %v1944_v55  ;;  %v1107_v17 = vmul.f32 0.5, %v2632_v5  ;;  %v680_v13 = vmul.f32 0.70710677, %v2683_v9  ;;  %v645_v5 = vmul.f32 0.5, %v2638_v15  ;;  %v2733_v61 = vpop.f32.mrf.mxu0 }
 0x183   : > { %v1948_v16 = vpop.eup %1947  ;;  %800 = vst [vmem:[%s2550_s24 + $0x80] sm:$0xff] %v768_v0  ;;  %v1233_v53 = vmul.f32 %v1201_v45, %v1105_v46  ;;  %v1204_v8 = vadd.f32 1.0, %v1946_v2  ;;  %1969 = verf.f32 %v1146_v58  ;;  %v1145_v4 = vmul.f32 0.70710677, %v2685_v10  ;;  %v2737_v34 = vpop.f32.mrf.mxu1 }
 0x184   : > { %v1950_v14 = vpop.eup %1949  ;;  %v771_v12 = vmul.f32 %v739_v3, %v643_v54  ;;  %v738_v26 = vadd.f32 1.0, %v1948_v16  ;;  %1971 = verf.f32 %v680_v13  ;;  %v683_v24 = vmul.f32 0.70710677, %v2694_v23  ;;  %v2748_v54 = vpop.f32.mrf.mxu0 }
 0x185   : > { %v1952_v19 = vpop.eup %1951  ;;  %1265 = vst [vmem:[%s2555_s26 + $0x80] sm:$0xff] %v1233_v53  ;;  %v1236_v20 = vmul.f32 %v1204_v8, %v1108_v60  ;;  %v1203_v22 = vadd.f32 1.0, %v1950_v14  ;;  %1973 = verf.f32 %v1145_v4  ;;  %v1110_v31 = vmul.f32 0.5, %v2640_v56  ;;  %v2752_v0 = vpop.f32.mrf.mxu1 }
 0x186   : > { %v1954_v57 = vpop.eup %1953  ;;  %803 = vst [vmem:[%s2550_s24 + $0x98] sm:$0xff] %v771_v12  ;;  %v770_v21 = vmul.f32 %v738_v26, %v642_v11  ;;  %v741_v27 = vadd.f32 1.0, %v1952_v19  ;;  %v1148_v33 = vmul.f32 0.70710677, %v2697_v32  ;;  %v644_v35 = vmul.f32 0.5, %v2646_v28  ;;  %v2760_v13 = vpop.f32.mrf.mxu0 }
 0x187   : > { %v1956_v25 = vpop.eup %1955  ;;  %1268 = vst [vmem:[%s2555_s26 + $0x98] sm:$0xff] %v1236_v20  ;;  %v1235_v30 = vmul.f32 %v1203_v22, %v1107_v17  ;;  %v1206_v37 = vadd.f32 1.0, %v1954_v57  ;;  %1975 = verf.f32 %v683_v24  ;;  %v1109_v56 = vmul.f32 0.5, %v2648_v29  ;;  %v2765_v4 = vpop.f32.mrf.mxu1 }
 0x188   : > { %802 = vst [vmem:[%s2550_s24 + $0x90] sm:$0xff] %v770_v21  ;;  %v773_v15 = vmul.f32 %v741_v27, %v645_v5  ;;  %v740_v38 = vadd.f32 1.0, %v1956_v25  ;;  %v1958_v36 = vpop.eup %1957  ;;  %1977 = verf.f32 %v1148_v33  ;;  %v682_v48 = vmul.f32 0.70710677, %v2706_v50 }
 0x189   : > { %1267 = vst [vmem:[%s2555_s26 + $0x90] sm:$0xff] %v1235_v30  ;;  %v1238_v40 = vmul.f32 %v1206_v37, %v1110_v31  ;;  %v1205_v43 = vadd.f32 1.0, %v1958_v36  ;;  %v647_v28 = vmul.f32 0.5, %v2657_v39  ;;  %v1147_v46 = vmul.f32 0.70710677, %v2711_v7 }
 0x18a   : > { %v1960_v41 = vpop.eup %1959  ;;  %805 = vst [vmem:[%s2550_s24 + $0xa8] sm:$0xff] %v773_v15  ;;  %v772_v42 = vmul.f32 %v740_v38, %v644_v35  ;;  %v1112_v51 = vmul.f32 0.5, %v2659_v62  ;;  %1979 = verf.f32 %v682_v48  ;;  %v685_v29 = vmul.f32 0.70710677, %v2721_v59 }
 0x18b   : > { %v1962_v49 = vpop.eup %1961  ;;  %1270 = vst [vmem:[%s2555_s26 + $0xa8] sm:$0xff] %v1238_v40  ;;  %v743_v44 = vadd.f32 1.0, %v1960_v41  ;;  %v1237_v63 = vmul.f32 %v1205_v43, %v1109_v56  ;;  %1981 = verf.f32 %v1147_v46  ;;  %v1150_v39 = vmul.f32 0.70710677, %v2724_v18 }
 0x18c   : > { %804 = vst [vmem:[%s2550_s24 + $0xa0] sm:$0xff] %v772_v42  ;;  %v1208_v55 = vadd.f32 1.0, %v1962_v49  ;;  %v1964_v45 = vpop.eup %1963  ;;  %1983 = verf.f32 %v685_v29  ;;  %v684_v62 = vmul.f32 0.70710677, %v2733_v61  ;;  %v646_v11 = vmul.f32 0.5, %v2665_v47 }
 0x18d   : > { %v775_v60 = vmul.f32 %v743_v44, %v647_v28  ;;  %v1966_v2 = vpop.eup %1965  ;;  %1269 = vst [vmem:[%s2555_s26 + $0xa0] sm:$0xff] %v1237_v63  ;;  %v742_v58 = vadd.f32 1.0, %v1964_v45  ;;  %1985 = verf.f32 %v1150_v39  ;;  %v1111_v53 = vmul.f32 0.5, %v2667_v6 }
 0x18e   : > { %v1240_v3 = vmul.f32 %v1208_v55, %v1112_v51  ;;  %v1968_v16 = vpop.eup %1967  ;;  %v1207_v8 = vadd.f32 1.0, %v1966_v2  ;;  %1987 = verf.f32 %v684_v62  ;;  %v1149_v17 = vmul.f32 0.70710677, %v2737_v34 }
 0x18f   : > { %807 = vst [vmem:[%s2550_s24 + $0xb8] sm:$0xff] %v775_v60  ;;  %v774_v14 = vmul.f32 %v742_v58, %v646_v11  ;;  %v649_v12 = vmul.f32 0.5, %v2673_v52  ;;  %v745_v26 = vadd.f32 1.0, %v1968_v16  ;;  %v687_v47 = vmul.f32 0.70710677, %v2748_v54 }
 0x190   : > { %1272 = vst [vmem:[%s2555_s26 + $0xb8] sm:$0xff] %v1240_v3  ;;  %v1970_v19 = vpop.eup %1969  ;;  %v1239_v20 = vmul.f32 %v1207_v8, %v1111_v53  ;;  %v1114_v6 = vmul.f32 0.5, %v2675_v1  ;;  %1989 = verf.f32 %v1149_v17  ;;  %v1152_v22 = vmul.f32 0.70710677, %v2752_v0 }
 0x191   : > { %v1972_v5 = vpop.eup %1971  ;;  %806 = vst [vmem:[%s2550_s24 + $0xb0] sm:$0xff] %v774_v14  ;;  %v777_v57 = vmul.f32 %v745_v26, %v649_v12  ;;  %v1210_v21 = vadd.f32 1.0, %v1970_v19  ;;  %1991 = verf.f32 %v687_v47  ;;  %v686_v52 = vmul.f32 0.70710677, %v2760_v13 }
 0x192   : > { %v1974_v27 = vpop.eup %1973  ;;  %1271 = vst [vmem:[%s2555_s26 + $0xb0] sm:$0xff] %v1239_v20  ;;  %v648_v24 = vmul.f32 0.5, %v2683_v9  ;;  %v744_v25 = vadd.f32 1.0, %v1972_v5  ;;  %1993 = verf.f32 %v1152_v22  ;;  %v1151_v1 = vmul.f32 0.70710677, %v2765_v4 }
 0x193   : > { %809 = vst [vmem:[%s2550_s24 + $0xc8] sm:$0xff] %v777_v57  ;;  %v1242_v30 = vmul.f32 %v1210_v21, %v1114_v6  ;;  %v1113_v31 = vmul.f32 0.5, %v2685_v10  ;;  %v1209_v37 = vadd.f32 1.0, %v1974_v27  ;;  %1995 = verf.f32 %v686_v52 }
 0x194   : > { %v1976_v33 = vpop.eup %1975  ;;  %v776_v15 = vmul.f32 %v744_v25, %v648_v24  ;;  %1997 = verf.f32 %v1151_v1  ;;  %v651_v9 = vmul.f32 0.5, %v2694_v23  ;;  %v1116_v40 = vmul.f32 0.5, %v2697_v32 }
 0x195   : > { %v1978_v35 = vpop.eup %1977  ;;  %1274 = vst [vmem:[%s2555_s26 + $0xc8] sm:$0xff] %v1242_v30  ;;  %v1241_v38 = vmul.f32 %v1209_v37, %v1113_v31  ;;  %v747_v36 = vadd.f32 1.0, %v1976_v33  ;;  %v650_v43 = vmul.f32 0.5, %v2706_v50  ;;  %v1115_v49 = vmul.f32 0.5, %v2711_v7 }
 0x196   : > { %808 = vst [vmem:[%s2550_s24 + $0xc0] sm:$0xff] %v776_v15  ;;  %v1212_v56 = vadd.f32 1.0, %v1978_v35  ;;  %v653_v51 = vmul.f32 0.5, %v2721_v59  ;;  %v1118_v39 = vmul.f32 0.5, %v2724_v18  ;;  %v652_v7 = vmul.f32 0.5, %v2733_v61 }
 0x197   : > { %v1980_v48 = vpop.eup %1979  ;;  %1273 = vst [vmem:[%s2555_s26 + $0xc0] sm:$0xff] %v1241_v38  ;;  %v779_v10 = vmul.f32 %v747_v36, %v651_v9  ;;  %v1117_v11 = vmul.f32 0.5, %v2737_v34  ;;  %v655_v16 = vmul.f32 0.5, %v2748_v54  ;;  %v1120_v17 = vmul.f32 0.5, %v2752_v0 }
 0x198   : > { %v1982_v41 = vpop.eup %1981  ;;  %v1244_v42 = vmul.f32 %v1212_v56, %v1116_v40  ;;  %v746_v28 = vadd.f32 1.0, %v1980_v48  ;;  %v654_v26 = vmul.f32 0.5, %v2760_v13  ;;  %v1119_v0 = vmul.f32 0.5, %v2765_v4 }
 0x199   : > { %v1984_v46 = vpop.eup %1983  ;;  %811 = vst [vmem:[%s2550_s24 + $0xd8] sm:$0xff] %v779_v10  ;;  %v1211_v23 = vadd.f32 1.0, %v1982_v41 }
 0x19a   : > { %v1986_v44 = vpop.eup %1985  ;;  %1276 = vst [vmem:[%s2555_s26 + $0xd8] sm:$0xff] %v1244_v42  ;;  %v778_v32 = vmul.f32 %v746_v28, %v650_v43  ;;  %v749_v29 = vadd.f32 1.0, %v1984_v46 }
 0x19b   : > { %v1988_v63 = vpop.eup %1987  ;;  %v1243_v55 = vmul.f32 %v1211_v23, %v1115_v49  ;;  %v1214_v50 = vadd.f32 1.0, %v1986_v44 }
 0x19c   : > { %810 = vst [vmem:[%s2550_s24 + $0xd0] sm:$0xff] %v778_v32  ;;  %v781_v45 = vmul.f32 %v749_v29, %v653_v51  ;;  %v748_v60 = vadd.f32 1.0, %v1988_v63 }
 0x19d   : > { %v1990_v62 = vpop.eup %1989  ;;  %1275 = vst [vmem:[%s2555_s26 + $0xd0] sm:$0xff] %v1243_v55  ;;  %v1246_v2 = vmul.f32 %v1214_v50, %v1118_v39 }
 0x19e   : > { %v1992_v3 = vpop.eup %1991  ;;  %813 = vst [vmem:[%s2550_s24 + $0xe8] sm:$0xff] %v781_v45  ;;  %v780_v59 = vmul.f32 %v748_v60, %v652_v7  ;;  %v1213_v58 = vadd.f32 1.0, %v1990_v62 }
 0x19f   : > { %v1994_v18 = vpop.eup %1993  ;;  %1278 = vst [vmem:[%s2555_s26 + $0xe8] sm:$0xff] %v1246_v2  ;;  %v751_v53 = vadd.f32 1.0, %v1992_v3 }
 0x1a0   : > { %v1996_v61 = vpop.eup %1995  ;;  %812 = vst [vmem:[%s2550_s24 + $0xe0] sm:$0xff] %v780_v59  ;;  %v1245_v8 = vmul.f32 %v1213_v58, %v1117_v11  ;;  %v1216_v14 = vadd.f32 1.0, %v1994_v18 }
 0x1a1   : > { %v1998_v12 = vpop.eup %1997  ;;  %v783_v34 = vmul.f32 %v751_v53, %v655_v16  ;;  %v750_v47 = vadd.f32 1.0, %v1996_v61 }
 0x1a2   : > { %1277 = vst [vmem:[%s2555_s26 + $0xe0] sm:$0xff] %v1245_v8  ;;  %v1248_v54 = vmul.f32 %v1216_v14, %v1120_v17  ;;  %v1215_v19 = vadd.f32 1.0, %v1998_v12 }
 0x1a3   : > { %815 = vst [vmem:[%s2550_s24 + $0xf8] sm:$0xff] %v783_v34  ;;  %v782_v13 = vmul.f32 %v750_v47, %v654_v26 }
 0x1a4   : > { %1280 = vst [vmem:[%s2555_s26 + $0xf8] sm:$0xff] %v1248_v54  ;;  %v1247_v20 = vmul.f32 %v1215_v19, %v1119_v0 }
 0x1a5   : > { %814 = vst [vmem:[%s2550_s24 + $0xf0] sm:$0xff] %v782_v13 }
 0x1a6   : > { %1279 = vst [vmem:[%s2555_s26 + $0xf0] sm:$0xff] %v1247_v20 }
 0x1a7   : > { %2120 = shalt.err (!%p2117_p12)
}
 0x1a8   : > { %s2121_s2 = scalar_lea.hbm %s2802_s6, 4096  ;;  %s2125_s24 = scalar_lea.hbm %s2897_s4, 8192 }
 0x1a9   : > { %p2122_p13 = scmp.ne.s32.totalorder %s2802_s6, %s2121_s2  ;;  %p2126_p10 = scmp.lt.s32.totalorder %s2802_s6, %s2897_s4 }
 0x1aa   : > { %p2127_p7 = scmp.lt.s32.totalorder %s2125_s24, %s2121_s2 }
 0x1ab   : > { %p2123_p0 = pnand %p2122_p13, %p2368_p3 }
 0x1ac   : > { %p2128_p1 = por %p2127_p7, %p2126_p10 }
 0x1ad   : > { %p2124_p5 = pneg %p2123_p0 }
 0x1af   : > { %p2129_p4 = pnand %p2128_p1, %p2124_p5 }
 0x1b1   : > { %2132 = shalt.err (!%p2129_p4)
}
 0x1b2   : > { %s2238_s21 = smov 128   ;;  %s2239_s11 = smov 8  }
 0x1b3   : > { %1786 = dma.vmem_to_hbm [thread:$0]  (%p2368_p3), %s2807_s25, 4096, %s2802_s6, %s1282_s12, %s2238_s21, %s2238_s21, %s2239_s11  }
 0x1b4   : > { %s1287_s30 = scalar_lea.sflag [#allocation12], %s2420_s1  ;;  %s2133_s13 = scalar_lea.vmem %s2816_s8, 4096 }
 0x1b5   : > { %p2134_p8 = scmp.ne.s32.totalorder %s2816_s8, %s2133_s13  ;;  %s2240_s15 = smov [#allocation11]  }
 0x1b6   : > { %s2137_s3 = sshll.u32 %s2240_s15, 4  ;;  %s2138_s3 = int_to_ptr.vmem [resolvable:$false] %s2137_s3 }
 0x1b7   : > { %p2135_p2 = pnand %p2134_p8, %p2368_p3  ;;  %s2139_s7 = scalar_lea.vmem %s2138_s3, 8192 }
 0x1b8   : > { %p2140_p9 = scmp.lt.s32.totalorder %s2816_s8, %s2138_s3  ;;  %p2141_p12 = scmp.lt.s32.totalorder %s2139_s7, %s2133_s13 }
 0x1b9   : > { %p2136_p11 = pneg %p2135_p2 }
 0x1ba   : > { %p2142_p13 = por %p2141_p12, %p2140_p9 }
 0x1bc   : > { %p2143_p0 = pnand %p2142_p13, %p2136_p11 }
 0x1be   : > { %2146 = shalt.err (!%p2143_p0)
}
 0x1bf   : > { %s2147_s25 = scalar_lea.hbm %s2814_s0, 4096  ;;  %s2151_s12 = scalar_lea.hbm %s2898_s5, 8192 }
 0x1c0   : > { %p2148_p5 = scmp.ne.s32.totalorder %s2814_s0, %s2147_s25  ;;  %p2152_p1 = scmp.lt.s32.totalorder %s2814_s0, %s2898_s5 }
 0x1c1   : > { %p2153_p4 = scmp.lt.s32.totalorder %s2151_s12, %s2147_s25 }
 0x1c2   : > { %p2149_p10 = pnand %p2148_p5, %p2368_p3 }
 0x1c3   : > { %p2154_p8 = por %p2153_p4, %p2152_p1 }
 0x1c4   : > { %p2150_p7 = pneg %p2149_p10 }
 0x1c6   : > { %p2155_p2 = pnand %p2154_p8, %p2150_p7 }
 0x1c8   : > { %2158 = shalt.err (!%p2155_p2)
}
 0x1c9   : > { %1787 = dma.vmem_to_hbm [thread:$0]  (%p2368_p3), %s2816_s8, 4096, %s2814_s0, %s1287_s30, %s2238_s21, %s2238_s21, %s2239_s11  }
 0x1ca PF: > { %s1335_s28 = sand.u32 1, %s2209_s18   ;;  %p2919_p11 = scmp.ge.s32.totalorder %s2229_s23, 2 }
 0x1cb   : > { %s1336_s10 = scalar_lea.sflag [#allocation4], %s1335_s28 }
 0x1cc   : > { %p1805_p9 = pnand %p2919_p11, %p2316_p6 }
 0x1ce   : > { %p1806_p12 = pneg %p1805_p9 }
 0x1d0   : > { %2200 = dma.done.wait (%p1806_p12), %s1336_s10, 4096  }
 0x1d1   : > { %2202 = vsyncadd (%p1806_p12), %s1336_s10, 4294963200  ;;  %s1345_s24 = scalar_lea.sflag [#allocation12], %s1335_s28 }
 0x1d2   : > { %2204 = dma.done.wait (%p1806_p12), %s1345_s24, 4096  }
 0x1d3   : > { %2206 = vsyncadd (%p1806_p12), %s1345_s24, 4294963200  ;;  %s29_s23 = sadd.s32 1, %s2229_s23   ;;  %s2920_s18 = smov %s2213_s19 }
 0x1d4   : > { %p26_p13 = scmp.ge.s32.totalorder %s29_s23, 4   ;;  %s2921_s19 = smov %s2217_s20 }
 0x1d5   : > { %s2922_s20 = smov %s2379_s9  ;;  %s2923_s21 = smov %s2225_s22 }
 0x1d6   : > { %s2924_s22 = smov %s2926_s17  ;;  %28 = sbr.rel (!%p26_p13) target bundleno = 16 (0x10), region = 119 }
 0x1db   :  { %1350 = vsyncpa [#allocation3], 1 }
 0x1dc   :  { %1352 = vsyncpa [#allocation3 + $0x1], 1 }
 0x1dd   :  { %1353 = vsyncpa [#allocation6], 1 }
 0x1de   :  { %1355 = vsyncpa [#allocation6 + $0x1], 1 }
 0x1df   :  { %1356 = vsyncpa [#allocation9], 1 }
 0x1e0   :  { %1357 = vsyncpa [#allocation4], 1 }
 0x1e1   :  { %1359 = vsyncpa [#allocation4 + $0x1], 1 }
 0x1e2   :  { %1360 = vsyncpa [#allocation12], 1 }
 0x1e3   :  { %1362 = vsyncpa [#allocation12 + $0x1], 1 }

</bundles_post_ra>
